<compile_context>
chip_gen: v7x
topology: tpu7x:2x2x1
jax: 0.10.0
libtpu: 0.0.40
codegen_flags: <defaults>
</compile_context>

<pallas_src>
import functools
import math

import jax
import jax.numpy as jnp
from jax import lax
from jax.experimental import pallas as pl
from jax.experimental.pallas import tpu as pltpu

# -------------------- model config (small, deterministic) --------------------
BATCH = 2
SEQ = 8
MODEL_DIM = 32
N_Q_HEADS = 4
N_KV_HEADS = 2
HEAD_DIM = MODEL_DIM // N_Q_HEADS          # 8
ROPE_THETA = 10000.0
EPS = float(jnp.finfo(jnp.float32).eps)    # matches nn.RMSNorm(eps=None) for f32


# ------------------------------ fused kernel ---------------------------------
def fused_block_kernel(x_ref, anw_ref, fnw_ref,
                       wq_ref, wk_ref, wv_ref, wo_ref,
                       w1a_ref, w1g_ref, w2_ref, w3_ref,
                       cq_ref, sq_ref, ck_ref, sk_ref,
                       rq_ref, rk_ref, o_ref,
                       *, n_q_heads, n_kv_heads, head_dim, eps, scale):
    x = x_ref[...]                                        # (S, D) one batch elem
    seq = x.shape[0]

    # ---------------- attention branch ----------------
    h = x * lax.rsqrt(jnp.mean(x * x, axis=-1, keepdims=True) + eps) * anw_ref[...]

    q = jnp.dot(h, wq_ref[...], preferred_element_type=jnp.float32)   # (S, Hq*hd)
    k = jnp.dot(h, wk_ref[...], preferred_element_type=jnp.float32)   # (S, Hkv*hd)
    v = jnp.dot(h, wv_ref[...], preferred_element_type=jnp.float32)   # (S, Hkv*hd)

    # RoPE: out = x*cos + pair_swap(x)*sin.  pair_swap is done as a tiny MXU
    # matmul against a (+-1) permutation matrix -> no in-kernel lane shuffles.
    q = q * cq_ref[...] + jnp.dot(q, rq_ref[...],
                                  preferred_element_type=jnp.float32) * sq_ref[...]
    k = k * ck_ref[...] + jnp.dot(k, rk_ref[...],
                                  preferred_element_type=jnp.float32) * sk_ref[...]

    # Fold the softmax scale into q (touches S*hd elements instead of S*S).
    q = q * scale

    # Causal mask, built once and reused by every head.
    row = lax.broadcasted_iota(jnp.int32, (seq, seq), 0)
    col = lax.broadcasted_iota(jnp.int32, (seq, seq), 1)
    mask = col <= row

    group = n_q_heads // n_kv_heads
    head_outs = []
    for hq in range(n_q_heads):
        hk = hq // group                                  # GQA head mapping
        qh = q[:, hq * head_dim:(hq + 1) * head_dim]      # (S, hd)
        kh = k[:, hk * head_dim:(hk + 1) * head_dim]
        vh = v[:, hk * head_dim:(hk + 1) * head_dim]
        s = lax.dot_general(qh, kh, (((1,), (1,)), ((), ())),
                            preferred_element_type=jnp.float32)        # (S, S)
        m = jnp.max(jnp.where(mask, s, -1e30), axis=-1, keepdims=True)
        p = jnp.where(mask, jnp.exp(s - m), 0.0)          # mask AFTER exp
        denom = jnp.sum(p, axis=-1, keepdims=True)
        oh = jnp.dot(p, vh, preferred_element_type=jnp.float32)
        head_outs.append(oh * pl.reciprocal(denom, approx=True))
    attn = jnp.concatenate(head_outs, axis=-1)            # (S, Hq*hd)

    x1 = x + jnp.dot(attn, wo_ref[...], preferred_element_type=jnp.float32)

    # ---------------- feed-forward branch ----------------
    g = x1 * lax.rsqrt(jnp.mean(x1 * x1, axis=-1, keepdims=True) + eps) * fnw_ref[...]
    a = jnp.dot(g, w1a_ref[...], preferred_element_type=jnp.float32)   # (S, 2D)
    gt = jnp.dot(g, w1g_ref[...], preferred_element_type=jnp.float32)  # (S, 2D)
    h2 = jnp.dot(g, w2_ref[...], preferred_element_type=jnp.float32)   # (S, 2D)
    sw = a * (gt * jax.nn.sigmoid(gt)) * h2                            # SwiGLU * W2
    y = jnp.dot(sw, w3_ref[...], preferred_element_type=jnp.float32)   # (S, D)

    # TODO(synk): dropout is a no-op here (eval path / p=0); KV-cache decode
    # path (start_pos != None with caching) is not implemented.
    o_ref[...] = (x1 + y).astype(o_ref.dtype)


# ------------------------------ wrapper ---------------------------------------
@jax.jit
def _run_block(x, prepared):
    B, S, D = x.shape
    hq_dim = N_Q_HEADS * HEAD_DIM
    hkv_dim = N_KV_HEADS * HEAD_DIM
    kernel = functools.partial(
        fused_block_kernel,
        n_q_heads=N_Q_HEADS, n_kv_heads=N_KV_HEADS, head_dim=HEAD_DIM,
        eps=EPS, scale=1.0 / math.sqrt(HEAD_DIM))

    def whole(shape):            # full-array block, same for every grid step
        return pl.BlockSpec(shape, lambda b: (0, 0))

    out2d = pl.pallas_call(
        kernel,
        out_shape=jax.ShapeDtypeStruct((B * S, D), jnp.float32),
        grid=(B,),
        in_specs=[
            pl.BlockSpec((S, D), lambda b: (b, 0)),        # x (per-batch block)
            whole((1, D)), whole((1, D)),                  # att_norm, ffn_norm
            whole((D, hq_dim)),                            # wq_t
            whole((D, hkv_dim)), whole((D, hkv_dim)),      # wk_t, wv_t
            whole((hq_dim, D)),                            # wo_t
            whole((D, 2 * D)), whole((D, 2 * D)),          # w1a_t, w1g_t
            whole((D, 2 * D)), whole((2 * D, D)),          # w2_t, w3_t
            whole((S, hq_dim)), whole((S, hq_dim)),        # cos_q, sin_q
            whole((S, hkv_dim)), whole((S, hkv_dim)),      # cos_k, sin_k
            whole((hq_dim, hq_dim)), whole((hkv_dim, hkv_dim)),  # rot_q, rot_k
        ],
        out_specs=pl.BlockSpec((S, D), lambda b: (b, 0)),
        compiler_params=pltpu.CompilerParams(dimension_semantics=("parallel",)),
    )(x.reshape(B * S, D),
      prepared["att_norm"], prepared["ffn_norm"],
      prepared["wq_t"], prepared["wk_t"], prepared["wv_t"], prepared["wo_t"],
      prepared["w1a_t"], prepared["w1g_t"], prepared["w2_t"], prepared["w3_t"],
      prepared["cos_q"], prepared["sin_q"], prepared["cos_k"], prepared["sin_k"],
      prepared["rot_q"], prepared["rot_k"])
    return out2d.reshape(B, S, D)


def transformer_block(args, prepared):
    # mirrors TransformerBlock.forward((x, start_pos)) with start_pos=None
    x, start_pos = args
    return _run_block(x, prepared), start_pos


# ---------------------- one-time parameter preparation ------------------------
def prepare_params(params):
    """Pre-transpose weights to (in, out), split W1 into SwiGLU halves, and
    precompute RoPE cos/sin tables + pair-swap matrices (done once, outside
    the jitted forward)."""
    D, hd, S = MODEL_DIM, HEAD_DIM, SEQ

    def rot_mat(dim):
        # (x @ rot)[..., 2i] = -x[..., 2i+1];  (x @ rot)[..., 2i+1] = x[..., 2i]
        m = jnp.zeros((dim, dim), jnp.float32)
        idx = jnp.arange(0, dim, 2)
        m = m.at[idx + 1, idx].set(-1.0)
        m = m.at[idx, idx + 1].set(1.0)
        return m

    def rope_tables(n_heads):
        freqs = 1.0 / ROPE_THETA ** (
            jnp.arange(0, hd, 2, dtype=jnp.float32) / hd)            # (hd/2,)
        ang = jnp.outer(jnp.arange(S, dtype=jnp.float32), freqs)     # (S, hd/2)
        ang = jnp.repeat(ang, 2, axis=-1)                            # (S, hd)
        ang = jnp.tile(ang, (1, n_heads))                            # (S, H*hd)
        return jnp.cos(ang), jnp.sin(ang)

    cos_q, sin_q = rope_tables(N_Q_HEADS)
    cos_k, sin_k = rope_tables(N_KV_HEADS)
    w1 = params["w1"]                        # (4D, D) PyTorch layout
    return {
        "att_norm": params["att_norm"].reshape(1, D),
        "ffn_norm": params["ffn_norm"].reshape(1, D),
        "wq_t": params["wq"].T, "wk_t": params["wk"].T, "wv_t": params["wv"].T,
        "wo_t": params["wo"].T,
        "w1a_t": w1[: 2 * D, :].T,           # SwiGLU "x" half
        "w1g_t": w1[2 * D:, :].T,            # SwiGLU "gates" half
        "w2_t": params["w2"].T, "w3_t": params["w3"].T,
        "cos_q": cos_q, "sin_q": sin_q, "cos_k": cos_k, "sin_k": sin_k,
        "rot_q": rot_mat(N_Q_HEADS * hd), "rot_k": rot_mat(N_KV_HEADS * hd),
    }


# ------------------------------ pure-JAX reference ----------------------------
def apply_rope(x, theta):
    # x: (B, S, H, hd), interleaved (even, odd) pairs == torch.view_as_complex
    B, S, H, hd = x.shape
    freqs = 1.0 / theta ** (jnp.arange(0, hd, 2, dtype=jnp.float32) / hd)
    ang = jnp.outer(jnp.arange(S, dtype=jnp.float32), freqs)
    cos = jnp.cos(ang)[None, :, None, :]
    sin = jnp.sin(ang)[None, :, None, :]
    xr = x.reshape(B, S, H, hd // 2, 2)
    re, im = xr[..., 0], xr[..., 1]
    out_re = re * cos - im * sin
    out_im = re * sin + im * cos
    return jnp.stack([out_re, out_im], axis=-1).reshape(B, S, H, hd)


def reference_block(x, params):
    def rms(t, w):
        return t * lax.rsqrt(jnp.mean(t * t, axis=-1, keepdims=True) + EPS) * w

    B, S, D = x.shape
    hd, Hq, Hkv = HEAD_DIM, N_Q_HEADS, N_KV_HEADS
    h = rms(x, params["att_norm"])
    q = (h @ params["wq"].T).reshape(B, S, Hq, hd)
    k = (h @ params["wk"].T).reshape(B, S, Hkv, hd)
    v = (h @ params["wv"].T).reshape(B, S, Hkv, hd)
    q = apply_rope(q, ROPE_THETA)
    k = apply_rope(k, ROPE_THETA)
    qt = q.transpose(0, 2, 1, 3)
    kt = jnp.repeat(k.transpose(0, 2, 1, 3), Hq // Hkv, axis=1)
    vt = jnp.repeat(v.transpose(0, 2, 1, 3), Hq // Hkv, axis=1)
    s = jnp.einsum("bhqd,bhkd->bhqk", qt, kt) / math.sqrt(hd)
    mask = jnp.tril(jnp.ones((S, S), dtype=bool))
    s = jnp.where(mask[None, None], s, -1e30)
    p = jax.nn.softmax(s, axis=-1)
    o = jnp.einsum("bhqk,bhkd->bhqd", p, vt).transpose(0, 2, 1, 3).reshape(B, S, D)
    x = x + o @ params["wo"].T
    g = rms(x, params["ffn_norm"])
    h1 = g @ params["w1"].T
    a, gate = jnp.split(h1, 2, axis=-1)
    sw = a * jax.nn.silu(gate)
    f = (sw * (g @ params["w2"].T)) @ params["w3"].T
    return x + f


# ----------------------------------- main -------------------------------------
def init_params(key):
    def linear(k, out_dim, in_dim):
        bound = 1.0 / math.sqrt(in_dim)
        return jax.random.uniform(k, (out_dim, in_dim), jnp.float32, -bound, bound)

    ks = jax.random.split(key, 7)
    D = MODEL_DIM
    return {
        "att_norm": jnp.ones((D,), jnp.float32),
        "ffn_norm": jnp.ones((D,), jnp.float32),
        "wq": linear(ks[0], N_Q_HEADS * HEAD_DIM, D),
        "wk": linear(ks[1], N_KV_HEADS * HEAD_DIM, D),
        "wv": linear(ks[2], N_KV_HEADS * HEAD_DIM, D),
        "wo": linear(ks[3], D, N_Q_HEADS * HEAD_DIM),
        "w1": linear(ks[4], 4 * D, D),
        "w2": linear(ks[5], 2 * D, D),
        "w3": linear(ks[6], D, 2 * D),
    }


if __name__ == "__main__":
    key = jax.random.PRNGKey(0)
    pkey, xkey = jax.random.split(key)
    params = init_params(pkey)
    prepared = prepare_params(params)          # one-time weight prep (no .T per call)
    x = jax.random.normal(xkey, (BATCH, SEQ, MODEL_DIM), jnp.float32)

    out, start_pos = transformer_block((x, None), prepared)
    out = jax.block_until_ready(out)

    ref = jax.block_until_ready(reference_block(x, params))
    if not jnp.allclose(out, ref, rtol=2e-2, atol=2e-2):
        raise AssertionError("Pallas output does not match JAX reference")

    print("KERNEL_OK")
</pallas_src>

<mosaic_0001>
module attributes {stable_mosaic.version = 11 : i64} {
  func.func @fused_block_kernel(%arg0: i32, %arg1: memref<8x32xf32, #tpu.memory_space<vmem>>, %arg2: memref<1x32xf32, #tpu.memory_space<vmem>>, %arg3: memref<1x32xf32, #tpu.memory_space<vmem>>, %arg4: memref<32x32xf32, #tpu.memory_space<vmem>>, %arg5: memref<32x16xf32, #tpu.memory_space<vmem>>, %arg6: memref<32x16xf32, #tpu.memory_space<vmem>>, %arg7: memref<32x32xf32, #tpu.memory_space<vmem>>, %arg8: memref<32x64xf32, #tpu.memory_space<vmem>>, %arg9: memref<32x64xf32, #tpu.memory_space<vmem>>, %arg10: memref<32x64xf32, #tpu.memory_space<vmem>>, %arg11: memref<64x32xf32, #tpu.memory_space<vmem>>, %arg12: memref<8x32xf32, #tpu.memory_space<vmem>>, %arg13: memref<8x32xf32, #tpu.memory_space<vmem>>, %arg14: memref<8x16xf32, #tpu.memory_space<vmem>>, %arg15: memref<8x16xf32, #tpu.memory_space<vmem>>, %arg16: memref<32x32xf32, #tpu.memory_space<vmem>>, %arg17: memref<16x16xf32, #tpu.memory_space<vmem>>, %arg18: memref<8x32xf32, #tpu.memory_space<vmem>>) attributes {dimension_semantics = [#tpu.dimension_semantics<parallel>], iteration_bounds = array<i64: 2>, scalar_prefetch = 0 : i64, scratch_operands = 0 : i64, tpu.core_type = #tpu.core_type<tc>, window_params = [{transform_indices = @transform_0, window_bounds = array<i64: 8, 32>}, {pipeline_mode = #tpu.pipeline_mode<synchronous>, transform_indices = @transform_1, window_bounds = array<i64: 1, 32>}, {pipeline_mode = #tpu.pipeline_mode<synchronous>, transform_indices = @transform_2, window_bounds = array<i64: 1, 32>}, {pipeline_mode = #tpu.pipeline_mode<synchronous>, transform_indices = @transform_3, window_bounds = array<i64: 32, 32>}, {pipeline_mode = #tpu.pipeline_mode<synchronous>, transform_indices = @transform_4, window_bounds = array<i64: 32, 16>}, {pipeline_mode = #tpu.pipeline_mode<synchronous>, transform_indices = @transform_5, window_bounds = array<i64: 32, 16>}, {pipeline_mode = #tpu.pipeline_mode<synchronous>, transform_indices = @transform_6, window_bounds = array<i64: 32, 32>}, {pipeline_mode = #tpu.pipeline_mode<synchronous>, transform_indices = @transform_7, window_bounds = array<i64: 32, 64>}, {pipeline_mode = #tpu.pipeline_mode<synchronous>, transform_indices = @transform_8, window_bounds = array<i64: 32, 64>}, {pipeline_mode = #tpu.pipeline_mode<synchronous>, transform_indices = @transform_9, window_bounds = array<i64: 32, 64>}, {pipeline_mode = #tpu.pipeline_mode<synchronous>, transform_indices = @transform_10, window_bounds = array<i64: 64, 32>}, {pipeline_mode = #tpu.pipeline_mode<synchronous>, transform_indices = @transform_11, window_bounds = array<i64: 8, 32>}, {pipeline_mode = #tpu.pipeline_mode<synchronous>, transform_indices = @transform_12, window_bounds = array<i64: 8, 32>}, {pipeline_mode = #tpu.pipeline_mode<synchronous>, transform_indices = @transform_13, window_bounds = array<i64: 8, 16>}, {pipeline_mode = #tpu.pipeline_mode<synchronous>, transform_indices = @transform_14, window_bounds = array<i64: 8, 16>}, {pipeline_mode = #tpu.pipeline_mode<synchronous>, transform_indices = @transform_15, window_bounds = array<i64: 32, 32>}, {pipeline_mode = #tpu.pipeline_mode<synchronous>, transform_indices = @transform_16, window_bounds = array<i64: 16, 16>}, {transform_indices = @transform_17, window_bounds = array<i64: 8, 32>}]} {
    %c0 = arith.constant 0 : index
    %c0_0 = arith.constant 0 : index
    %0 = vector.load %arg1[%c0, %c0_0] : memref<8x32xf32, #tpu.memory_space<vmem>>, vector<8x32xf32>
    %1 = arith.mulf %0, %0 : vector<8x32xf32>
    %cst = arith.constant dense<0.000000e+00> : vector<8xf32>
    %2 = vector.multi_reduction <add>, %1, %cst [1] : vector<8x32xf32> to vector<8xf32>
    %3 = vector.shape_cast %2 : vector<8xf32> to vector<8x1xf32>
    %cst_1 = arith.constant 3.200000e+01 : f32
    %4 = vector.broadcast %cst_1 : f32 to vector<8x1xf32>
    %5 = arith.divf %3, %4 : vector<8x1xf32>
    %cst_2 = arith.constant 1.1920929E-7 : f32
    %6 = vector.broadcast %cst_2 : f32 to vector<8x1xf32>
    %7 = arith.addf %5, %6 : vector<8x1xf32>
    %8 = math.rsqrt %7 : vector<8x1xf32>
    %9 = vector.broadcast %8 : vector<8x1xf32> to vector<8x32xf32>
    %10 = arith.mulf %0, %9 : vector<8x32xf32>
    %c0_3 = arith.constant 0 : index
    %c0_4 = arith.constant 0 : index
    %11 = vector.load %arg2[%c0_3, %c0_4] : memref<1x32xf32, #tpu.memory_space<vmem>>, vector<1x32xf32>
    %12 = vector.broadcast %11 : vector<1x32xf32> to vector<8x32xf32>
    %13 = arith.mulf %10, %12 : vector<8x32xf32>
    %c0_5 = arith.constant 0 : index
    %c0_6 = arith.constant 0 : index
    %14 = vector.load %arg4[%c0_5, %c0_6] : memref<32x32xf32, #tpu.memory_space<vmem>>, vector<32x32xf32>
    %cst_7 = arith.constant dense<0.000000e+00> : vector<8x32xf32>
    %15 = tpu.matmul %13, %14, %cst_7 {dimension_numbers = #tpu.dot_dimension_numbers<[1], [0], [0], [1], [0, 0, 1, 1], [], []>} : vector<8x32xf32>, vector<32x32xf32>, vector<8x32xf32> -> vector<8x32xf32>
    %c0_8 = arith.constant 0 : index
    %c0_9 = arith.constant 0 : index
    %16 = vector.load %arg5[%c0_8, %c0_9] : memref<32x16xf32, #tpu.memory_space<vmem>>, vector<32x16xf32>
    %cst_10 = arith.constant dense<0.000000e+00> : vector<8x16xf32>
    %17 = tpu.matmul %13, %16, %cst_10 {dimension_numbers = #tpu.dot_dimension_numbers<[1], [0], [0], [1], [0, 0, 1, 1], [], []>} : vector<8x32xf32>, vector<32x16xf32>, vector<8x16xf32> -> vector<8x16xf32>
    %c0_11 = arith.constant 0 : index
    %c0_12 = arith.constant 0 : index
    %18 = vector.load %arg6[%c0_11, %c0_12] : memref<32x16xf32, #tpu.memory_space<vmem>>, vector<32x16xf32>
    %cst_13 = arith.constant dense<0.000000e+00> : vector<8x16xf32>
    %19 = tpu.matmul %13, %18, %cst_13 {dimension_numbers = #tpu.dot_dimension_numbers<[1], [0], [0], [1], [0, 0, 1, 1], [], []>} : vector<8x32xf32>, vector<32x16xf32>, vector<8x16xf32> -> vector<8x16xf32>
    %c0_14 = arith.constant 0 : index
    %c0_15 = arith.constant 0 : index
    %20 = vector.load %arg12[%c0_14, %c0_15] : memref<8x32xf32, #tpu.memory_space<vmem>>, vector<8x32xf32>
    %21 = arith.mulf %15, %20 : vector<8x32xf32>
    %c0_16 = arith.constant 0 : index
    %c0_17 = arith.constant 0 : index
    %22 = vector.load %arg16[%c0_16, %c0_17] : memref<32x32xf32, #tpu.memory_space<vmem>>, vector<32x32xf32>
    %cst_18 = arith.constant dense<0.000000e+00> : vector<8x32xf32>
    %23 = tpu.matmul %15, %22, %cst_18 {dimension_numbers = #tpu.dot_dimension_numbers<[1], [0], [0], [1], [0, 0, 1, 1], [], []>} : vector<8x32xf32>, vector<32x32xf32>, vector<8x32xf32> -> vector<8x32xf32>
    %c0_19 = arith.constant 0 : index
    %c0_20 = arith.constant 0 : index
    %24 = vector.load %arg13[%c0_19, %c0_20] : memref<8x32xf32, #tpu.memory_space<vmem>>, vector<8x32xf32>
    %25 = arith.mulf %23, %24 : vector<8x32xf32>
    %26 = arith.addf %21, %25 : vector<8x32xf32>
    %c0_21 = arith.constant 0 : index
    %c0_22 = arith.constant 0 : index
    %27 = vector.load %arg14[%c0_21, %c0_22] : memref<8x16xf32, #tpu.memory_space<vmem>>, vector<8x16xf32>
    %28 = arith.mulf %17, %27 : vector<8x16xf32>
    %c0_23 = arith.constant 0 : index
    %c0_24 = arith.constant 0 : index
    %29 = vector.load %arg17[%c0_23, %c0_24] : memref<16x16xf32, #tpu.memory_space<vmem>>, vector<16x16xf32>
    %cst_25 = arith.constant dense<0.000000e+00> : vector<8x16xf32>
    %30 = tpu.matmul %17, %29, %cst_25 {dimension_numbers = #tpu.dot_dimension_numbers<[1], [0], [0], [1], [0, 0, 1, 1], [], []>} : vector<8x16xf32>, vector<16x16xf32>, vector<8x16xf32> -> vector<8x16xf32>
    %c0_26 = arith.constant 0 : index
    %c0_27 = arith.constant 0 : index
    %31 = vector.load %arg15[%c0_26, %c0_27] : memref<8x16xf32, #tpu.memory_space<vmem>>, vector<8x16xf32>
    %32 = arith.mulf %30, %31 : vector<8x16xf32>
    %33 = arith.addf %28, %32 : vector<8x16xf32>
    %cst_28 = arith.constant 0.353553385 : f32
    %34 = vector.broadcast %cst_28 : f32 to vector<8x32xf32>
    %35 = arith.mulf %26, %34 : vector<8x32xf32>
    %36 = tpu.iota {dimensions = array<i32: 0>} : vector<8x8xi32>
    %37 = tpu.iota {dimensions = array<i32: 1>} : vector<8x8xi32>
    %38 = arith.cmpi sle, %37, %36 : vector<8x8xi32>
    %39 = vector.extract_strided_slice %35 {offsets = [0, 0], sizes = [8, 8], strides = [1, 1]} : vector<8x32xf32> to vector<8x8xf32>
    %40 = vector.extract_strided_slice %33 {offsets = [0, 0], sizes = [8, 8], strides = [1, 1]} : vector<8x16xf32> to vector<8x8xf32>
    %41 = vector.extract_strided_slice %19 {offsets = [0, 0], sizes = [8, 8], strides = [1, 1]} : vector<8x16xf32> to vector<8x8xf32>
    %cst_29 = arith.constant dense<0.000000e+00> : vector<8x8xf32>
    %42 = tpu.matmul %39, %40, %cst_29 {dimension_numbers = #tpu.dot_dimension_numbers<[1], [1], [0], [0], [0, 0, 1, 0], [], []>} : vector<8x8xf32>, vector<8x8xf32>, vector<8x8xf32> -> vector<8x8xf32>
    %cst_30 = arith.constant -1.000000e+30 : f32
    %43 = vector.broadcast %cst_30 : f32 to vector<8x8xf32>
    %44 = arith.select %38, %42, %43 : vector<8x8xi1>, vector<8x8xf32>
    %cst_31 = arith.constant dense<0xFF800000> : vector<8xf32>
    %45 = vector.multi_reduction <maximumf>, %44, %cst_31 [1] : vector<8x8xf32> to vector<8xf32>
    %46 = vector.shape_cast %45 : vector<8xf32> to vector<8x1xf32>
    %47 = vector.broadcast %46 : vector<8x1xf32> to vector<8x8xf32>
    %48 = arith.subf %42, %47 : vector<8x8xf32>
    %49 = math.exp %48 : vector<8x8xf32>
    %cst_32 = arith.constant 0.000000e+00 : f32
    %50 = vector.broadcast %cst_32 : f32 to vector<8x8xf32>
    %51 = arith.select %38, %49, %50 : vector<8x8xi1>, vector<8x8xf32>
    %cst_33 = arith.constant dense<0.000000e+00> : vector<8xf32>
    %52 = vector.multi_reduction <add>, %51, %cst_33 [1] : vector<8x8xf32> to vector<8xf32>
    %53 = vector.shape_cast %52 : vector<8xf32> to vector<8x1xf32>
    %cst_34 = arith.constant dense<0.000000e+00> : vector<8x8xf32>
    %54 = tpu.matmul %51, %41, %cst_34 {dimension_numbers = #tpu.dot_dimension_numbers<[1], [0], [0], [1], [0, 0, 1, 1], [], []>} : vector<8x8xf32>, vector<8x8xf32>, vector<8x8xf32> -> vector<8x8xf32>
    %55 = tpu.reciprocal %53 {approx = true} : vector<8x1xf32> -> vector<8x1xf32>
    %56 = vector.broadcast %55 : vector<8x1xf32> to vector<8x8xf32>
    %57 = arith.mulf %54, %56 : vector<8x8xf32>
    %58 = vector.extract_strided_slice %35 {offsets = [0, 8], sizes = [8, 8], strides = [1, 1]} : vector<8x32xf32> to vector<8x8xf32>
    %59 = vector.extract_strided_slice %33 {offsets = [0, 0], sizes = [8, 8], strides = [1, 1]} : vector<8x16xf32> to vector<8x8xf32>
    %60 = vector.extract_strided_slice %19 {offsets = [0, 0], sizes = [8, 8], strides = [1, 1]} : vector<8x16xf32> to vector<8x8xf32>
    %cst_35 = arith.constant dense<0.000000e+00> : vector<8x8xf32>
    %61 = tpu.matmul %58, %59, %cst_35 {dimension_numbers = #tpu.dot_dimension_numbers<[1], [1], [0], [0], [0, 0, 1, 0], [], []>} : vector<8x8xf32>, vector<8x8xf32>, vector<8x8xf32> -> vector<8x8xf32>
    %cst_36 = arith.constant -1.000000e+30 : f32
    %62 = vector.broadcast %cst_36 : f32 to vector<8x8xf32>
    %63 = arith.select %38, %61, %62 : vector<8x8xi1>, vector<8x8xf32>
    %cst_37 = arith.constant dense<0xFF800000> : vector<8xf32>
    %64 = vector.multi_reduction <maximumf>, %63, %cst_37 [1] : vector<8x8xf32> to vector<8xf32>
    %65 = vector.shape_cast %64 : vector<8xf32> to vector<8x1xf32>
    %66 = vector.broadcast %65 : vector<8x1xf32> to vector<8x8xf32>
    %67 = arith.subf %61, %66 : vector<8x8xf32>
    %68 = math.exp %67 : vector<8x8xf32>
    %cst_38 = arith.constant 0.000000e+00 : f32
    %69 = vector.broadcast %cst_38 : f32 to vector<8x8xf32>
    %70 = arith.select %38, %68, %69 : vector<8x8xi1>, vector<8x8xf32>
    %cst_39 = arith.constant dense<0.000000e+00> : vector<8xf32>
    %71 = vector.multi_reduction <add>, %70, %cst_39 [1] : vector<8x8xf32> to vector<8xf32>
    %72 = vector.shape_cast %71 : vector<8xf32> to vector<8x1xf32>
    %cst_40 = arith.constant dense<0.000000e+00> : vector<8x8xf32>
    %73 = tpu.matmul %70, %60, %cst_40 {dimension_numbers = #tpu.dot_dimension_numbers<[1], [0], [0], [1], [0, 0, 1, 1], [], []>} : vector<8x8xf32>, vector<8x8xf32>, vector<8x8xf32> -> vector<8x8xf32>
    %74 = tpu.reciprocal %72 {approx = true} : vector<8x1xf32> -> vector<8x1xf32>
    %75 = vector.broadcast %74 : vector<8x1xf32> to vector<8x8xf32>
    %76 = arith.mulf %73, %75 : vector<8x8xf32>
    %77 = vector.extract_strided_slice %35 {offsets = [0, 16], sizes = [8, 8], strides = [1, 1]} : vector<8x32xf32> to vector<8x8xf32>
    %78 = vector.extract_strided_slice %33 {offsets = [0, 8], sizes = [8, 8], strides = [1, 1]} : vector<8x16xf32> to vector<8x8xf32>
    %79 = vector.extract_strided_slice %19 {offsets = [0, 8], sizes = [8, 8], strides = [1, 1]} : vector<8x16xf32> to vector<8x8xf32>
    %cst_41 = arith.constant dense<0.000000e+00> : vector<8x8xf32>
    %80 = tpu.matmul %77, %78, %cst_41 {dimension_numbers = #tpu.dot_dimension_numbers<[1], [1], [0], [0], [0, 0, 1, 0], [], []>} : vector<8x8xf32>, vector<8x8xf32>, vector<8x8xf32> -> vector<8x8xf32>
    %cst_42 = arith.constant -1.000000e+30 : f32
    %81 = vector.broadcast %cst_42 : f32 to vector<8x8xf32>
    %82 = arith.select %38, %80, %81 : vector<8x8xi1>, vector<8x8xf32>
    %cst_43 = arith.constant dense<0xFF800000> : vector<8xf32>
    %83 = vector.multi_reduction <maximumf>, %82, %cst_43 [1] : vector<8x8xf32> to vector<8xf32>
    %84 = vector.shape_cast %83 : vector<8xf32> to vector<8x1xf32>
    %85 = vector.broadcast %84 : vector<8x1xf32> to vector<8x8xf32>
    %86 = arith.subf %80, %85 : vector<8x8xf32>
    %87 = math.exp %86 : vector<8x8xf32>
    %cst_44 = arith.constant 0.000000e+00 : f32
    %88 = vector.broadcast %cst_44 : f32 to vector<8x8xf32>
    %89 = arith.select %38, %87, %88 : vector<8x8xi1>, vector<8x8xf32>
    %cst_45 = arith.constant dense<0.000000e+00> : vector<8xf32>
    %90 = vector.multi_reduction <add>, %89, %cst_45 [1] : vector<8x8xf32> to vector<8xf32>
    %91 = vector.shape_cast %90 : vector<8xf32> to vector<8x1xf32>
    %cst_46 = arith.constant dense<0.000000e+00> : vector<8x8xf32>
    %92 = tpu.matmul %89, %79, %cst_46 {dimension_numbers = #tpu.dot_dimension_numbers<[1], [0], [0], [1], [0, 0, 1, 1], [], []>} : vector<8x8xf32>, vector<8x8xf32>, vector<8x8xf32> -> vector<8x8xf32>
    %93 = tpu.reciprocal %91 {approx = true} : vector<8x1xf32> -> vector<8x1xf32>
    %94 = vector.broadcast %93 : vector<8x1xf32> to vector<8x8xf32>
    %95 = arith.mulf %92, %94 : vector<8x8xf32>
    %96 = vector.extract_strided_slice %35 {offsets = [0, 24], sizes = [8, 8], strides = [1, 1]} : vector<8x32xf32> to vector<8x8xf32>
    %97 = vector.extract_strided_slice %33 {offsets = [0, 8], sizes = [8, 8], strides = [1, 1]} : vector<8x16xf32> to vector<8x8xf32>
    %98 = vector.extract_strided_slice %19 {offsets = [0, 8], sizes = [8, 8], strides = [1, 1]} : vector<8x16xf32> to vector<8x8xf32>
    %cst_47 = arith.constant dense<0.000000e+00> : vector<8x8xf32>
    %99 = tpu.matmul %96, %97, %cst_47 {dimension_numbers = #tpu.dot_dimension_numbers<[1], [1], [0], [0], [0, 0, 1, 0], [], []>} : vector<8x8xf32>, vector<8x8xf32>, vector<8x8xf32> -> vector<8x8xf32>
    %cst_48 = arith.constant -1.000000e+30 : f32
    %100 = vector.broadcast %cst_48 : f32 to vector<8x8xf32>
    %101 = arith.select %38, %99, %100 : vector<8x8xi1>, vector<8x8xf32>
    %cst_49 = arith.constant dense<0xFF800000> : vector<8xf32>
    %102 = vector.multi_reduction <maximumf>, %101, %cst_49 [1] : vector<8x8xf32> to vector<8xf32>
    %103 = vector.shape_cast %102 : vector<8xf32> to vector<8x1xf32>
    %104 = vector.broadcast %103 : vector<8x1xf32> to vector<8x8xf32>
    %105 = arith.subf %99, %104 : vector<8x8xf32>
    %106 = math.exp %105 : vector<8x8xf32>
    %cst_50 = arith.constant 0.000000e+00 : f32
    %107 = vector.broadcast %cst_50 : f32 to vector<8x8xf32>
    %108 = arith.select %38, %106, %107 : vector<8x8xi1>, vector<8x8xf32>
    %cst_51 = arith.constant dense<0.000000e+00> : vector<8xf32>
    %109 = vector.multi_reduction <add>, %108, %cst_51 [1] : vector<8x8xf32> to vector<8xf32>
    %110 = vector.shape_cast %109 : vector<8xf32> to vector<8x1xf32>
    %cst_52 = arith.constant dense<0.000000e+00> : vector<8x8xf32>
    %111 = tpu.matmul %108, %98, %cst_52 {dimension_numbers = #tpu.dot_dimension_numbers<[1], [0], [0], [1], [0, 0, 1, 1], [], []>} : vector<8x8xf32>, vector<8x8xf32>, vector<8x8xf32> -> vector<8x8xf32>
    %112 = tpu.reciprocal %110 {approx = true} : vector<8x1xf32> -> vector<8x1xf32>
    %113 = vector.broadcast %112 : vector<8x1xf32> to vector<8x8xf32>
    %114 = arith.mulf %111, %113 : vector<8x8xf32>
    %115 = tpu.concatenate %57, %76, %95, %114 in 1 : vector<8x8xf32>, vector<8x8xf32>, vector<8x8xf32>, vector<8x8xf32> -> vector<8x32xf32>
    %c0_53 = arith.constant 0 : index
    %c0_54 = arith.constant 0 : index
    %116 = vector.load %arg7[%c0_53, %c0_54] : memref<32x32xf32, #tpu.memory_space<vmem>>, vector<32x32xf32>
    %cst_55 = arith.constant dense<0.000000e+00> : vector<8x32xf32>
    %117 = tpu.matmul %115, %116, %cst_55 {dimension_numbers = #tpu.dot_dimension_numbers<[1], [0], [0], [1], [0, 0, 1, 1], [], []>} : vector<8x32xf32>, vector<32x32xf32>, vector<8x32xf32> -> vector<8x32xf32>
    %118 = arith.addf %0, %117 : vector<8x32xf32>
    %119 = arith.mulf %118, %118 : vector<8x32xf32>
    %cst_56 = arith.constant dense<0.000000e+00> : vector<8xf32>
    %120 = vector.multi_reduction <add>, %119, %cst_56 [1] : vector<8x32xf32> to vector<8xf32>
    %121 = vector.shape_cast %120 : vector<8xf32> to vector<8x1xf32>
    %cst_57 = arith.constant 3.200000e+01 : f32
    %122 = vector.broadcast %cst_57 : f32 to vector<8x1xf32>
    %123 = arith.divf %121, %122 : vector<8x1xf32>
    %cst_58 = arith.constant 1.1920929E-7 : f32
    %124 = vector.broadcast %cst_58 : f32 to vector<8x1xf32>
    %125 = arith.addf %123, %124 : vector<8x1xf32>
    %126 = math.rsqrt %125 : vector<8x1xf32>
    %127 = vector.broadcast %126 : vector<8x1xf32> to vector<8x32xf32>
    %128 = arith.mulf %118, %127 : vector<8x32xf32>
    %c0_59 = arith.constant 0 : index
    %c0_60 = arith.constant 0 : index
    %129 = vector.load %arg3[%c0_59, %c0_60] : memref<1x32xf32, #tpu.memory_space<vmem>>, vector<1x32xf32>
    %130 = vector.broadcast %129 : vector<1x32xf32> to vector<8x32xf32>
    %131 = arith.mulf %128, %130 : vector<8x32xf32>
    %c0_61 = arith.constant 0 : index
    %c0_62 = arith.constant 0 : index
    %132 = vector.load %arg8[%c0_61, %c0_62] : memref<32x64xf32, #tpu.memory_space<vmem>>, vector<32x64xf32>
    %cst_63 = arith.constant dense<0.000000e+00> : vector<8x64xf32>
    %133 = tpu.matmul %131, %132, %cst_63 {dimension_numbers = #tpu.dot_dimension_numbers<[1], [0], [0], [1], [0, 0, 1, 1], [], []>} : vector<8x32xf32>, vector<32x64xf32>, vector<8x64xf32> -> vector<8x64xf32>
    %c0_64 = arith.constant 0 : index
    %c0_65 = arith.constant 0 : index
    %134 = vector.load %arg9[%c0_64, %c0_65] : memref<32x64xf32, #tpu.memory_space<vmem>>, vector<32x64xf32>
    %cst_66 = arith.constant dense<0.000000e+00> : vector<8x64xf32>
    %135 = tpu.matmul %131, %134, %cst_66 {dimension_numbers = #tpu.dot_dimension_numbers<[1], [0], [0], [1], [0, 0, 1, 1], [], []>} : vector<8x32xf32>, vector<32x64xf32>, vector<8x64xf32> -> vector<8x64xf32>
    %c0_67 = arith.constant 0 : index
    %c0_68 = arith.constant 0 : index
    %136 = vector.load %arg10[%c0_67, %c0_68] : memref<32x64xf32, #tpu.memory_space<vmem>>, vector<32x64xf32>
    %cst_69 = arith.constant dense<0.000000e+00> : vector<8x64xf32>
    %137 = tpu.matmul %131, %136, %cst_69 {dimension_numbers = #tpu.dot_dimension_numbers<[1], [0], [0], [1], [0, 0, 1, 1], [], []>} : vector<8x32xf32>, vector<32x64xf32>, vector<8x64xf32> -> vector<8x64xf32>
    %138 = arith.negf %135 : vector<8x64xf32>
    %139 = math.exp %138 : vector<8x64xf32>
    %cst_70 = arith.constant 1.000000e+00 : f32
    %140 = vector.broadcast %cst_70 : f32 to vector<8x64xf32>
    %141 = arith.addf %140, %139 : vector<8x64xf32>
    %142 = arith.divf %140, %141 : vector<8x64xf32>
    %143 = arith.mulf %135, %142 : vector<8x64xf32>
    %144 = arith.mulf %133, %143 : vector<8x64xf32>
    %145 = arith.mulf %144, %137 : vector<8x64xf32>
    %c0_71 = arith.constant 0 : index
    %c0_72 = arith.constant 0 : index
    %146 = vector.load %arg11[%c0_71, %c0_72] : memref<64x32xf32, #tpu.memory_space<vmem>>, vector<64x32xf32>
    %cst_73 = arith.constant dense<0.000000e+00> : vector<8x32xf32>
    %147 = tpu.matmul %145, %146, %cst_73 {dimension_numbers = #tpu.dot_dimension_numbers<[1], [0], [0], [1], [0, 0, 1, 1], [], []>} : vector<8x64xf32>, vector<64x32xf32>, vector<8x32xf32> -> vector<8x32xf32>
    %148 = arith.addf %118, %147 : vector<8x32xf32>
    %c0_74 = arith.constant 0 : index
    %c0_75 = arith.constant 0 : index
    %149 = vector.load %arg18[%c0_74, %c0_75] : memref<8x32xf32, #tpu.memory_space<vmem>>, vector<8x32xf32>
    tpu.vector_store %arg18[%c0_74, %c0_75], %148 {strides = array<i32>} : memref<8x32xf32, #tpu.memory_space<vmem>>, vector<8x32xf32>,
    return
  }
  func.func @transform_0(%arg0: i32) -> (i32, i32) {
    %c0_i32 = arith.constant 0 : i32
    %c0_i32_0 = arith.constant 0 : i32
    return %arg0, %c0_i32 : i32, i32
  }
  func.func @transform_1(%arg0: i32) -> (i32, i32) {
    %c0_i32 = arith.constant 0 : i32
    %c0_i32_0 = arith.constant 0 : i32
    %c0_i32_1 = arith.constant 0 : i32
    return %c0_i32, %c0_i32_0 : i32, i32
  }
  func.func @transform_2(%arg0: i32) -> (i32, i32) {
    %c0_i32 = arith.constant 0 : i32
    %c0_i32_0 = arith.constant 0 : i32
    %c0_i32_1 = arith.constant 0 : i32
    return %c0_i32, %c0_i32_0 : i32, i32
  }
  func.func @transform_3(%arg0: i32) -> (i32, i32) {
    %c0_i32 = arith.constant 0 : i32
    %c0_i32_0 = arith.constant 0 : i32
    %c0_i32_1 = arith.constant 0 : i32
    return %c0_i32, %c0_i32_0 : i32, i32
  }
  func.func @transform_4(%arg0: i32) -> (i32, i32) {
    %c0_i32 = arith.constant 0 : i32
    %c0_i32_0 = arith.constant 0 : i32
    %c0_i32_1 = arith.constant 0 : i32
    return %c0_i32, %c0_i32_0 : i32, i32
  }
  func.func @transform_5(%arg0: i32) -> (i32, i32) {
    %c0_i32 = arith.constant 0 : i32
    %c0_i32_0 = arith.constant 0 : i32
    %c0_i32_1 = arith.constant 0 : i32
    return %c0_i32, %c0_i32_0 : i32, i32
  }
  func.func @transform_6(%arg0: i32) -> (i32, i32) {
    %c0_i32 = arith.constant 0 : i32
    %c0_i32_0 = arith.constant 0 : i32
    %c0_i32_1 = arith.constant 0 : i32
    return %c0_i32, %c0_i32_0 : i32, i32
  }
  func.func @transform_7(%arg0: i32) -> (i32, i32) {
    %c0_i32 = arith.constant 0 : i32
    %c0_i32_0 = arith.constant 0 : i32
    %c0_i32_1 = arith.constant 0 : i32
    return %c0_i32, %c0_i32_0 : i32, i32
  }
  func.func @transform_8(%arg0: i32) -> (i32, i32) {
    %c0_i32 = arith.constant 0 : i32
    %c0_i32_0 = arith.constant 0 : i32
    %c0_i32_1 = arith.constant 0 : i32
    return %c0_i32, %c0_i32_0 : i32, i32
  }
  func.func @transform_9(%arg0: i32) -> (i32, i32) {
    %c0_i32 = arith.constant 0 : i32
    %c0_i32_0 = arith.constant 0 : i32
    %c0_i32_1 = arith.constant 0 : i32
    return %c0_i32, %c0_i32_0 : i32, i32
  }
  func.func @transform_10(%arg0: i32) -> (i32, i32) {
    %c0_i32 = arith.constant 0 : i32
    %c0_i32_0 = arith.constant 0 : i32
    %c0_i32_1 = arith.constant 0 : i32
    return %c0_i32, %c0_i32_0 : i32, i32
  }
  func.func @transform_11(%arg0: i32) -> (i32, i32) {
    %c0_i32 = arith.constant 0 : i32
    %c0_i32_0 = arith.constant 0 : i32
    %c0_i32_1 = arith.constant 0 : i32
    return %c0_i32, %c0_i32_0 : i32, i32
  }
  func.func @transform_12(%arg0: i32) -> (i32, i32) {
    %c0_i32 = arith.constant 0 : i32
    %c0_i32_0 = arith.constant 0 : i32
    %c0_i32_1 = arith.constant 0 : i32
    return %c0_i32, %c0_i32_0 : i32, i32
  }
  func.func @transform_13(%arg0: i32) -> (i32, i32) {
    %c0_i32 = arith.constant 0 : i32
    %c0_i32_0 = arith.constant 0 : i32
    %c0_i32_1 = arith.constant 0 : i32
    return %c0_i32, %c0_i32_0 : i32, i32
  }
  func.func @transform_14(%arg0: i32) -> (i32, i32) {
    %c0_i32 = arith.constant 0 : i32
    %c0_i32_0 = arith.constant 0 : i32
    %c0_i32_1 = arith.constant 0 : i32
    return %c0_i32, %c0_i32_0 : i32, i32
  }
  func.func @transform_15(%arg0: i32) -> (i32, i32) {
    %c0_i32 = arith.constant 0 : i32
    %c0_i32_0 = arith.constant 0 : i32
    %c0_i32_1 = arith.constant 0 : i32
    return %c0_i32, %c0_i32_0 : i32, i32
  }
  func.func @transform_16(%arg0: i32) -> (i32, i32) {
    %c0_i32 = arith.constant 0 : i32
    %c0_i32_0 = arith.constant 0 : i32
    %c0_i32_1 = arith.constant 0 : i32
    return %c0_i32, %c0_i32_0 : i32, i32
  }
  func.func @transform_17(%arg0: i32) -> (i32, i32) {
    %c0_i32 = arith.constant 0 : i32
    %c0_i32_0 = arith.constant 0 : i32
    return %arg0, %c0_i32 : i32, i32
  }
}

</mosaic_0001>

<bundles_post_ra>
// kernel: _run_block.1
= control target key start
LH: loop header
LB: loop body
LE: loop exit
PB: predicated region body
PF: predicated region fallthrough
CT: control target
= control target key end

     0   :  { %s3715_s0 = inlined_call_operand.hbm [shape: f32[16,32], index: 0, kind: input, shape index: {}]   ;;  %s3716_s1 = inlined_call_operand.vmem [shape: f32[1,32], index: 1, kind: input, shape index: {}]   ;;  %s3717_s2 = inlined_call_operand.vmem [shape: f32[1,32], index: 2, kind: input, shape index: {}]   ;;  %s3718_s3 = inlined_call_operand.vmem [shape: f32[32,32], index: 3, kind: input, shape index: {}]   ;;  %s3719_s4 = inlined_call_operand.vmem [shape: f32[32,16], index: 4, kind: input, shape index: {}]   ;;  %s3720_s5 = inlined_call_operand.vmem [shape: f32[32,16], index: 5, kind: input, shape index: {}]   ;;  %s3721_s6 = inlined_call_operand.vmem [shape: f32[32,32], index: 6, kind: input, shape index: {}]   ;;  %s3722_s7 = inlined_call_operand.vmem [shape: f32[32,64], index: 7, kind: input, shape index: {}]   ;;  %s3723_s8 = inlined_call_operand.vmem [shape: f32[32,64], index: 8, kind: input, shape index: {}]   ;;  %s3724_s9 = inlined_call_operand.vmem [shape: f32[32,64], index: 9, kind: input, shape index: {}]   ;;  %s3725_s10 = inlined_call_operand.vmem [shape: f32[64,32], index: 10, kind: input, shape index: {}]   ;;  %s3726_s11 = inlined_call_operand.hbm [shape: f32[8,32], index: 11, kind: input, shape index: {}]   ;;  %s3727_s12 = inlined_call_operand.hbm [shape: f32[8,32], index: 12, kind: input, shape index: {}]   ;;  %s3728_s13 = inlined_call_operand.hbm [shape: f32[8,16], index: 13, kind: input, shape index: {}]   ;;  %s3729_s14 = inlined_call_operand.hbm [shape: f32[8,16], index: 14, kind: input, shape index: {}]   ;;  %s3730_s15 = inlined_call_operand.hbm [shape: f32[32,32], index: 15, kind: input, shape index: {}]   ;;  %s3731_s16 = inlined_call_operand.hbm [shape: f32[16,16], index: 16, kind: input, shape index: {}]   ;;  %s3732_s17 = inlined_call_operand.hbm [shape: f32[16,32], index: 17, kind: output, shape index: {}]  }
   0x1   :  { %3745 = sst [smem:[#allocation20_spill]] %s3715_s0 }
   0x2   :  { %3746 = sst [smem:[#allocation21_spill]] %s3716_s1 }
   0x3   :  { %3747 = sst [smem:[#allocation22_spill]] %s3717_s2 }
   0x4   :  { %3748 = sst [smem:[#allocation23_spill]] %s3718_s3 }
   0x5   :  { %3749 = sst [smem:[#allocation24_spill]] %s3719_s4 }
   0x6   :  { %3750 = sst [smem:[#allocation25_spill]] %s3721_s6 }
   0x7   :  { %3751 = sst [smem:[#allocation26_spill]] %s3722_s7 }
   0x8   :  { %3752 = sst [smem:[#allocation27_spill]] %s3723_s8 }
   0x9   :  { %3753 = sst [smem:[#allocation28_spill]] %s3724_s9 }
   0xa   :  { %3754 = sst [smem:[#allocation29_spill]] %s3725_s10 }
   0xb   :  { %3755 = sst [smem:[#allocation30_spill]] %s3726_s11 }
   0xc   :  { %3756 = sst [smem:[#allocation31_spill]] %s3728_s13 }
   0xd   :  { %3757 = sst [smem:[#allocation32_spill]] %s3732_s17 }
   0xe   :  { %22 = vsyncpa [#allocation3], 0 }
   0xf   :  { %24 = vsyncpa [#allocation3 + $0x1], 0 }
  0x10   :  { %25 = vsyncpa [#allocation6], 0 }
  0x11   :  { %26 = vsyncpa [#allocation9], 0 }
  0x12   :  { %27 = vsyncpa [#allocation12], 0 }
  0x13   :  { %28 = vsyncpa [#allocation4], 0 }
  0x14   :  { %30 = vsyncpa [#allocation4 + $0x1], 0  ;;  %s3139_s24 = smov 0   ;;  %s3141_s25 = smov 0  }
  0x15   :  { %s3143_s26 = smov 0   ;;  %s3145_s27 = smov 0  }
  0x16 LB: > { %s3030_s28 = smov [#allocation5]   ;;  %s3160_s0 = sadd.s32 4294967295, %s3028_s27   ;;  %s3028_s27 = sphi %s3145_s27, %s3796_s27   ;;  %s3024_s26 = sphi %s3143_s26, %s3795_s26   ;;  %s3020_s25 = sphi %s3141_s25, %s3794_s25   ;;  %s3016_s24 = sphi %s3139_s24, %s3793_s24  }
  0x17   : > { %s472_s29 = sshll.u32 %s3030_s28, 4  ;;  %p2277_p0 = scmp.ge.s32.totalorder %s3028_s27, 1  ;;  %s473_s29 = int_to_ptr.vmem [resolvable:$true] %s472_s29 }
  0x18   : > { %p3736_p1 = scmp.eq.s32.totalorder %s3160_s0, 0  ;;  %p429_p2 = scmp.lt.s32.totalorder %s3028_s27, 3 }
  0x19   : > { %s3031_s18 = smov [#allocation8]   ;;  %s3032_s1 = smov [#allocation11]  }
  0x1a   : > { %p3165_p3 = pnand %p2277_p0, %p429_p2  ;;  %s494_s19 = sshll.u32 %s3031_s18, 4  ;;  %s3172_s19 = int_to_ptr.vmem [resolvable:$true] %s494_s19 }
  0x1b   : > { %s515_s20 = sshll.u32 %s3032_s1, 4  ;;  %s3760_s11 = sld [smem:[#allocation30_spill]]  ;;  %s3180_s20 = int_to_ptr.vmem [resolvable:$true] %s515_s20 }
  0x1c   : > { %s3758_s30 = scalar_select %p3165_p3, 1, 0 }
  0x1d   : > { %p2638_p5 = pneg %p3165_p3 }
  0x1f   : > { %p3176_p6 = pnand %p2638_p5, %p3736_p1 }
  0x21   : > { %s2752_s28 = scalar_lea.hbm %s3760_s11, 128  ;;  %p3190_p8 = pneg %p3176_p6 }
  0x22   : > { %p2753_p7 = scmp.ne.s32.totalorder %s3760_s11, %s2752_s28  ;;  %p2759_p11 = scmp.lt.u32.totalorder %s2752_s28, %s3760_s11 }
  0x24   : > { %p2755_p9 = pnand %p3190_p8, %p2753_p7 }
  0x26   : > { %p2756_p10 = pneg %p2755_p9 }
  0x28   : > { %p2761_p12 = pnand %p2759_p11, %p2756_p10 }
  0x2a   : > { %2764 = shalt.err (!%p2761_p12)
}
  0x2b   : > { %s2765_s22 = scalar_lea.vmem %s473_s29, 128  ;;  %p2773_p5 = scmp.lt.s32.totalorder %s473_s29, %s473_s29 }
  0x2c   : > { %p2766_p13 = scmp.ne.s32.totalorder %s473_s29, %s2765_s22  ;;  %p2774_p4 = scmp.lt.s32.totalorder %s2765_s22, %s2765_s22 }
  0x2e   : > { %p2768_p0 = pnand %p2766_p13, %p3190_p8  ;;  %p2775_p1 = por %p2774_p4, %p2773_p5 }
  0x30   : > { %p2769_p2 = pneg %p2768_p0 }
  0x32   : > { %p2776_p3 = pnand %p2775_p1, %p2769_p2 }
  0x34   : > { %2779 = shalt.err (!%p2776_p3)
}
  0x35   : > { %2641 = dma.hbm_to_vmem [thread:$0]  (!%p3176_p6), %s3760_s11, 128, %s473_s29, [#allocation6]  }
  0x36   : > { %s3762_s13 = sld [smem:[#allocation31_spill]] }
  0x3c   : > { %s2780_s28 = scalar_lea.hbm %s3762_s13, 128 }
  0x3d   : > { %p2781_p7 = scmp.ne.s32.totalorder %s3762_s13, %s2780_s28  ;;  %p2787_p1 = scmp.lt.u32.totalorder %s2780_s28, %s3762_s13 }
  0x3f   : > { %p2783_p9 = pnand %p2781_p7, %p3190_p8 }
  0x41   : > { %p2784_p4 = pneg %p2783_p9 }
  0x43   : > { %p2789_p3 = pnand %p2787_p1, %p2784_p4 }
  0x45   : > { %2792 = shalt.err (!%p2789_p3)
}
  0x46   : > { %s2793_s29 = scalar_lea.vmem %s3172_s19, 128  ;;  %p2801_p13 = scmp.lt.s32.totalorder %s3172_s19, %s3172_s19 }
  0x47   : > { %p2794_p10 = scmp.ne.s32.totalorder %s3172_s19, %s2793_s29  ;;  %p2802_p0 = scmp.lt.s32.totalorder %s2793_s29, %s2793_s29 }
  0x49   : > { %p2796_p11 = pnand %p2794_p10, %p3190_p8  ;;  %p2803_p2 = por %p2802_p0, %p2801_p13 }
  0x4b   : > { %p2797_p12 = pneg %p2796_p11 }
  0x4d   : > { %p2804_p5 = pnand %p2803_p2, %p2797_p12 }
  0x4f   : > { %2807 = shalt.err (!%p2804_p5)
}
  0x50   : > { %2647 = dma.hbm_to_vmem [thread:$0]  (!%p3176_p6), %s3762_s13, 128, %s3172_s19, [#allocation9]  }
  0x51   : > { %s2808_s2 = scalar_lea.hbm %s3730_s15, 512 }
  0x52   : > { %p2809_p7 = scmp.ne.s32.totalorder %s3730_s15, %s2808_s2  ;;  %p2815_p1 = scmp.lt.u32.totalorder %s2808_s2, %s3730_s15 }
  0x54   : > { %p2811_p9 = pnand %p2809_p7, %p3190_p8 }
  0x56   : > { %p2812_p4 = pneg %p2811_p9 }
  0x58   : > { %p2817_p3 = pnand %p2815_p1, %p2812_p4 }
  0x5a   : > { %2820 = shalt.err (!%p2817_p3)
}
  0x5b   : > { %s2821_s19 = scalar_lea.vmem %s3180_s20, 512  ;;  %p2829_p13 = scmp.lt.s32.totalorder %s3180_s20, %s3180_s20 }
  0x5c   : > { %p2822_p10 = scmp.ne.s32.totalorder %s3180_s20, %s2821_s19  ;;  %p2830_p0 = scmp.lt.s32.totalorder %s2821_s19, %s2821_s19 }
  0x5e   : > { %p2824_p11 = pnand %p2822_p10, %p3190_p8  ;;  %p2831_p2 = por %p2830_p0, %p2829_p13 }
  0x60   : > { %p2825_p12 = pneg %p2824_p11 }
  0x62   : > { %p2832_p5 = pnand %p2831_p2, %p2825_p12 }
  0x64   : > { %2835 = shalt.err (!%p2832_p5)
}
  0x65   : > { %s3033_s29 = smov 128   ;;  %s3034_s8 = smov 8  }
  0x66   : > { %2653 = dma.hbm_to_vmem [thread:$0]  (!%p3176_p6), %s3730_s15, 512, %s3180_s20, [#allocation12], %s3033_s29, %s3033_s29, %s3034_s8  }
  0x67   : > { %s3035_s17 = smov [#allocation7]   ;;  %s3036_s23 = smov [#allocation10]  }
  0x68   : > { %s483_s2 = sshll.u32 %s3035_s17, 4  ;;  %s505_s28 = sshll.u32 %s3036_s23, 4  ;;  %s484_s2 = int_to_ptr.vmem [resolvable:$true] %s483_s2  ;;  %s506_s28 = int_to_ptr.vmem [resolvable:$true] %s505_s28 }
  0x69   : > { %s2836_s19 = scalar_lea.hbm %s3727_s12, 128 }
  0x6a   : > { %p2837_p7 = scmp.ne.s32.totalorder %s3727_s12, %s2836_s19  ;;  %p2843_p1 = scmp.lt.u32.totalorder %s2836_s19, %s3727_s12 }
  0x6c   : > { %p2839_p9 = pnand %p2837_p7, %p3190_p8 }
  0x6e   : > { %p2840_p4 = pneg %p2839_p9 }
  0x70   : > { %p2845_p3 = pnand %p2843_p1, %p2840_p4 }
  0x72   : > { %2848 = shalt.err (!%p2845_p3)
}
  0x73   : > { %s2849_s20 = scalar_lea.vmem %s484_s2, 128  ;;  %p2857_p13 = scmp.lt.s32.totalorder %s484_s2, %s484_s2 }
  0x74   : > { %p2850_p10 = scmp.ne.s32.totalorder %s484_s2, %s2849_s20  ;;  %p2858_p0 = scmp.lt.s32.totalorder %s2849_s20, %s2849_s20 }
  0x76   : > { %p2852_p11 = pnand %p2850_p10, %p3190_p8  ;;  %p2859_p2 = por %p2858_p0, %p2857_p13 }
  0x78   : > { %p2853_p12 = pneg %p2852_p11 }
  0x7a   : > { %p2860_p5 = pnand %p2859_p2, %p2853_p12 }
  0x7c   : > { %2863 = shalt.err (!%p2860_p5)
}
  0x7d   : > { %2644 = dma.hbm_to_vmem [thread:$0]  (!%p3176_p6), %s3727_s12, 128, %s484_s2, [#allocation6]  }
  0x7e   : > { %s2864_s9 = scalar_lea.hbm %s3729_s14, 128 }
  0x7f   : > { %p2865_p7 = scmp.ne.s32.totalorder %s3729_s14, %s2864_s9  ;;  %p2871_p1 = scmp.lt.u32.totalorder %s2864_s9, %s3729_s14 }
  0x81   : > { %p2867_p9 = pnand %p2865_p7, %p3190_p8 }
  0x83   : > { %p2868_p4 = pneg %p2867_p9 }
  0x85   : > { %p2873_p3 = pnand %p2871_p1, %p2868_p4 }
  0x87   : > { %2876 = shalt.err (!%p2873_p3)
}
  0x88   : > { %s2877_s22 = scalar_lea.vmem %s506_s28, 128  ;;  %p2885_p13 = scmp.lt.s32.totalorder %s506_s28, %s506_s28 }
  0x89   : > { %p2878_p10 = scmp.ne.s32.totalorder %s506_s28, %s2877_s22  ;;  %p2886_p0 = scmp.lt.s32.totalorder %s2877_s22, %s2877_s22 }
  0x8b   : > { %p2880_p11 = pnand %p2878_p10, %p3190_p8  ;;  %p2887_p2 = por %p2886_p0, %p2885_p13 }
  0x8d   : > { %p2881_p12 = pneg %p2880_p11 }
  0x8f   : > { %p2888_p5 = pnand %p2887_p2, %p2881_p12 }
  0x91   : > { %2891 = shalt.err (!%p2888_p5)
}
  0x92   : > { %2650 = dma.hbm_to_vmem [thread:$0]  (!%p3176_p6), %s3729_s14, 128, %s506_s28, [#allocation9]  }
  0x93   : > { %s3037_s20 = smov [#allocation13]   ;;  %s2892_s7 = scalar_lea.hbm %s3731_s16, 256 }
  0x94   : > { %s528_s11 = sshll.u32 %s3037_s20, 4  ;;  %p2893_p7 = scmp.ne.s32.totalorder %s3731_s16, %s2892_s7  ;;  %s529_s11 = int_to_ptr.vmem [resolvable:$true] %s528_s11 }
  0x95   : > { %p2899_p1 = scmp.lt.u32.totalorder %s2892_s7, %s3731_s16 }
  0x96   : > { %p2895_p9 = pnand %p2893_p7, %p3190_p8 }
  0x98   : > { %p2896_p4 = pneg %p2895_p9 }
  0x9a   : > { %p2901_p3 = pnand %p2899_p1, %p2896_p4 }
  0x9c   : > { %2904 = shalt.err (!%p2901_p3)
}
  0x9d   : > { %s2905_s28 = scalar_lea.vmem %s529_s11, 256  ;;  %p2913_p13 = scmp.lt.s32.totalorder %s529_s11, %s529_s11 }
  0x9e   : > { %p2906_p10 = scmp.ne.s32.totalorder %s529_s11, %s2905_s28  ;;  %p2914_p0 = scmp.lt.s32.totalorder %s2905_s28, %s2905_s28 }
  0xa0   : > { %p2908_p11 = pnand %p2906_p10, %p3190_p8  ;;  %p2915_p2 = por %p2914_p0, %p2913_p13 }
  0xa2   : > { %p2909_p12 = pneg %p2908_p11 }
  0xa4   : > { %p2916_p5 = pnand %p2915_p2, %p2909_p12 }
  0xa6   : > { %2919 = shalt.err (!%p2916_p5)
}
  0xa7   : > { %2656 = dma.hbm_to_vmem [thread:$0]  (!%p3176_p6), %s3731_s16, 256, %s529_s11, [#allocation12], %s3033_s29, %s3033_s29, %s3034_s8  }
  0xa8   : > { %s2276_s21 = sadd.s32 4294967294, %s3028_s27   ;;  %s3314_s18 = sadd.s32 1, %s3028_s27  }
  0xa9   : > { %s40_s2 = ssub.s32 %s3028_s27, %s3314_s18  ;;  %s43_s19 = sadd.s32 1, %s3024_s26 }
  0xaa   : > { %p41_p8 = scmp.eq.s32.totalorder %s40_s2, 0  ;;  %p50_p7 = scmp.ne.s32.totalorder %s3024_s26, %s3020_s25 }
  0xab   : > { %p51_p9 = scmp.eq.s32.totalorder %s3028_s27, 0  ;;  %p56_p4 = scmp.ne.s32.totalorder %s3020_s25, %s3016_s24 }
  0xac   : > { %s3325_s20 = scalar_select %p41_p8, %s3024_s26, %s43_s19  }
  0xad   : > { %p3327_p1 = por %p51_p9, %p50_p7  ;;  %p3764_p3 = scmp.eq.s32.totalorder %s3160_s0, 0 }
  0xae   : > { %p416_p10 = scmp.eq.s32.totalorder %s3160_s0, 1  ;;  %p422_p11 = scmp.eq.s32.totalorder %s2276_s21, 1 }
  0xaf   : > { %p3333_p6 = por %p3764_p3, %p56_p4  ;;  %p2671_p12 = scmp.lt.s32.totalorder %s3028_s27, 2 }
  0xb0   : > { %s542_s8 = sand.u32 1, %s3024_s26   ;;  %p3340_p13 = por %p416_p10, %p50_p7 }
  0xb1   : > { %p3344_p0 = por %p422_p11, %p56_p4  ;;  %s2285_s7 = sshll.u32 %s542_s8, 3 }
  0xb2   : > { %s3766_s11 = scalar_select %p3340_p13, 1, 0 }
  0xb3   : > { %s3767_s6 = scalar_select %p3344_p0, 1, 0 }
  0xb4   : > { %s2286_s9 = sshll.u32 %s3028_s27, 7  ;;  %s3768_s23 = sld [smem:[#allocation20_spill]] }
  0xb5   : > { %s546_s1 = scalar_lea.vmem [#allocation2], %s2285_s7  ;;  %p3358_p2 = pnand %p2671_p12, %p3327_p1 }
  0xb6   : > { %s553_s22 = sshll.u32 %s546_s1, 4  ;;  %s543_s2 = scalar_lea.sflag [#allocation3], %s542_s8  ;;  %s3354_s22 = int_to_ptr.vmem [resolvable:$true] %s553_s22 }
  0xb7   : > { %p2922_p8 = pneg %p3358_p2 }
  0xba   : > { %s3352_s28 = scalar_lea.hbm %s3768_s23, %s2286_s9  ;;  %s2925_s10 = scalar_lea.hbm %s3768_s23, 256 }
  0xbb   : > { %s2920_s19 = scalar_lea.hbm %s3352_s28, 128  ;;  %p2926_p4 = scmp.lt.u32.totalorder %s3352_s28, %s3768_s23 }
  0xbc   : > { %p2921_p5 = scmp.ne.s32.totalorder %s3352_s28, %s2920_s19  ;;  %p2927_p1 = scmp.lt.u32.totalorder %s2925_s10, %s2920_s19 }
  0xbd   : > { %p2929_p10 = scmp.lt.u32.totalorder %s2920_s19, %s3352_s28 }
  0xbe   : > { %p2923_p7 = pnand %p2922_p8, %p2921_p5  ;;  %p2928_p3 = por %p2927_p1, %p2926_p4 }
  0xc0   : > { %p2924_p9 = pneg %p2923_p7  ;;  %p2930_p11 = por %p2929_p10, %p2928_p3 }
  0xc2   : > { %p2931_p12 = pnand %p2930_p11, %p2924_p9 }
  0xc4   : > { %2934 = shalt.err (!%p2931_p12)
}
  0xc5   : > { %s2935_s8 = scalar_lea.vmem %s3354_s22, 128  ;;  %s3038_s1 = smov [#allocation2]  }
  0xc6   : > { %p2936_p5 = scmp.ne.s32.totalorder %s3354_s22, %s2935_s8  ;;  %s2940_s7 = sshll.u32 %s3038_s1, 4  ;;  %s2941_s7 = int_to_ptr.vmem [resolvable:$false] %s2940_s7 }
  0xc7   : > { %s2942_s9 = scalar_lea.vmem %s2941_s7, 256  ;;  %p2943_p13 = scmp.lt.s32.totalorder %s3354_s22, %s2941_s7 }
  0xc8   : > { %p2938_p7 = pnand %p2936_p5, %p2922_p8  ;;  %p2944_p4 = scmp.lt.s32.totalorder %s2942_s9, %s2935_s8 }
  0xca   : > { %p2939_p0 = pneg %p2938_p7  ;;  %p2945_p1 = por %p2944_p4, %p2943_p13 }
  0xcc   : > { %p2946_p3 = pnand %p2945_p1, %p2939_p0 }
  0xce   : > { %2949 = shalt.err (!%p2946_p3)
}
  0xcf   : > { %2660 = dma.hbm_to_vmem [thread:$0]  (!%p3358_p2), %s3352_s28, 128, %s3354_s22, %s543_s2  }
  0xd0   : > { %p3770_p9 = scmp.ne.s32.totalorder %s3758_s30, 0 }
  0xd1   : > { %s3390_s19 = sand.u32 (!%p3770_p9), 1, %s3020_s25  }
  0xd2   : > { %562 = sbr.rel (%p3770_p9) target bundleno = 2504 (0x9c8), region = 88  ;;  %s3743_s10 = sshll.u32 (!%p3770_p9), %s3390_s19, 3 }
  0xd3   : > { %s565_s13 = scalar_lea.sflag (!%p3770_p9), [#allocation3], %s3390_s19  ;;  %s568_s17 = scalar_lea.vmem (!%p3770_p9), [#allocation2], %s3743_s10 }
  0xd9   : > { %2995 = dma.done.wait (%p3333_p6), %s565_s13, 128  }
  0xda   : > { %2997 = vsyncadd (%p3333_p6), %s565_s13, 4294967168  ;;  %p3771_p13 = scmp.eq.s32.totalorder %s3160_s0, 0 }
  0xdc   : > { %2999 = dma.done.wait (%p3771_p13), [#allocation6], 256   ;;  %p3772_p0 = pmov %p3771_p13 }
  0xde   : > { %3001 = vsyncadd (%p3772_p0), [#allocation6], 4294967040  ;;  %p3773_p2 = pmov %p3772_p0 }
  0xdf   : > { %p3774_p8 = pmov %p3772_p0 }
  0xe0   : > { %3003 = dma.done.wait (%p3773_p2), [#allocation9], 256  }
  0xe1   : > { %3005 = vsyncadd (%p3774_p8), [#allocation9], 4294967040  ;;  %p3775_p10 = pmov %p3772_p0 }
  0xe2   : > { %p3776_p11 = pmov %p3772_p0 }
  0xe3   : > { %3007 = dma.done.wait (%p3775_p10), [#allocation12], 768  }
  0xe4   : > { %3009 = vsyncadd (%p3776_p11), [#allocation12], 4294966528  ;;  %v3412_v0 = vld [vmem:[%s568_s17] sm:$0xff]  ;;  %vm645_vm0 = vcmask 261120   ;;  %s3777_s3 = sld [smem:[#allocation23_spill]]  ;;  %v3039_v6 = vmov 0.0|0.0  }
  0xe5   : > { %v644_v1 = vmul.f32 %v3412_v0, %v3412_v0  ;;  %2547 = vmatprep.subr.bf16.mxu0 %v3039_v6  ;;  %vm3040_vm1 = vmmov 0   ;;  %v3041_v9 = vmov 0.0   ;;  %2565 = vmatprep.subr.bf16.mxu1 %v3039_v6  ;;  %v889_v11 = vld [vmem:[#allocation11] sm:$0xff]  ;;  %v890_v12 = vld [vmem:[#allocation11 + $0x8] sm:$0xff]  ;;  %v891_v13 = vld [vmem:[#allocation11 + $0x10] sm:$0xff]  ;;  %s3778_s4 = sld [smem:[#allocation24_spill]] }
  0xe6   : > { %2401 = vmatprep.mubr.msk.f32.mxu0 %vm3040_vm1, %v3041_v9  ;;  %2434 = vmatprep.mubr.msk.f32.mxu1 %vm3040_vm1, %v3041_v9  ;;  %v2566_v14 = vpack.c.bf16 %v890_v12, %v889_v11  ;;  %v892_v15 = vld [vmem:[#allocation11 + $0x18] sm:$0xff]  ;;  %s3779_s28 = sld [smem:[#allocation21_spill]]  ;;  %v813_v30 = vld [vmem:[%s3720_s5] sm:$0xff]  ;;  %v815_v33 = vld [vmem:[%s3720_s5 + $0x10] sm:$0xff]  ;;  %vm973_vm2 = vcmask 130048   ;;  %s3042_s22 = smov 120  }
  0xe7   : > { %v646_v2 = vsel %vm645_vm0, %v644_v1, 0.0  ;;  %v2569_v16 = vpack.c.bf16 %v892_v15, %v891_v13  ;;  %v814_v31 = vld [vmem:[%s3720_s5 + $0x8] sm:$0xff]  ;;  %v816_v34 = vld [vmem:[%s3720_s5 + $0x18] sm:$0xff]  ;;  %v971_v36 = vld [vmem:[#allocation13] sm:$0xff]  ;;  %vm1056_vm3 = vcmask 64512   ;;  %s3043_s21 = smov 112   ;;  %v1051_v1 = vlaneseq }
  0xe8   : > { %647 = vadd.xlane.f32.xlu0 %v646_v2  ;;  %2567 = vmatpush3.bf16.msra.mxu1 %v2566_v14  ;;  %v2560_v32 = vpack.c.bf16 %v814_v31, %v813_v30  ;;  %v2563_v35 = vpack.c.bf16 %v816_v34, %v815_v33  ;;  %v972_v37 = vld [vmem:[#allocation13 + $0x8] sm:$0xff]  ;;  %v887_v45 = vld [vmem:[#allocation5] sm:$0xff]  ;;  %v969_v53 = vld [vmem:[#allocation8] sm:$0xff]  ;;  %s3044_s2 = smov 104   ;;  %s3782_s7 = sld [smem:[#allocation25_spill]]  ;;  %vm1721_vm5 = vcmask 195584  }
  0xe9   : > { %2568 = vmatprep.subr.bf16.mxu1 %v3039_v6  ;;  %v2572_v38 = vpack.c.bf16 %v972_v37, %v971_v36  ;;  %v966_v46 = vld [vmem:[#allocation7] sm:$0xff]  ;;  %v1047_v54 = vld [vmem:[#allocation10] sm:$0xff]  ;;  %v1052_v2 = vshrl.u32 %v1051_v1, 7  ;;  %s3783_s9 = sld [smem:[#allocation26_spill]]  ;;  %s3785_s8 = sld [smem:[#allocation28_spill]]  ;;  %vm2059_vm6 = vcmask 523264  }
  0xea   : > { %v662_v3 = vld [vmem:[%s3777_s3] sm:$0xff]  ;;  %v663_v4 = vld [vmem:[%s3777_s3 + $0x8] sm:$0xff]  ;;  %v664_v5 = vld [vmem:[%s3777_s3 + $0x10] sm:$0xff]  ;;  %s3786_s29 = sld [smem:[#allocation22_spill]]  ;;  %s3789_s17 = sld [smem:[#allocation32_spill]] }
  0xeb   : > { %v2548_v7 = vpack.c.bf16 %v663_v4, %v662_v3  ;;  %v665_v8 = vld [vmem:[%s3777_s3 + $0x18] sm:$0xff]  ;;  %v739_v20 = vld [vmem:[%s3778_s4] sm:$0xff]  ;;  %v740_v21 = vld [vmem:[%s3778_s4 + $0x8] sm:$0xff]  ;;  %v1054_v3 = vand.u32 127, %v1051_v1  ;;  %p3790_p12 = scmp.ne.s32.totalorder %s3766_s11, 0 }
  0xec   : > { %v2551_v10 = vpack.c.bf16 %v665_v8, %v664_v5  ;;  %2570 = vmatpush3.bf16.msra.mxu1 %v2569_v16  ;;  %v2296_v23 = vld [vmem:[%s3779_s28] ss:$0 sm:$0xff]  ;;  %v2554_v25 = vpack.c.bf16 %v740_v21, %v739_v20  ;;  %v741_v27 = vld [vmem:[%s3778_s4 + $0x10] sm:$0xff]  ;;  %v742_v28 = vld [vmem:[%s3778_s4 + $0x18] sm:$0xff]  ;;  %s3784_s28 = sld [smem:[#allocation27_spill]] }
  0xed   : > { %2549 = vmatpush3.bf16.msra.mxu0 %v2548_v7  ;;  %2444 = vmatprep.subr.mxu1 %v3041_v9  ;;  %v2557_v29 = vpack.c.bf16 %v742_v28, %v741_v27  ;;  %vm3513_vm4 = vcmp.le.s32.totalorder %v1054_v3, %v1052_v2 }
  0xee   : > { %2550 = vmatprep.subr.bf16.mxu0 %v3039_v6 }
  0xf1   : > { %2552 = vmatpush3.bf16.msra.mxu0 %v2551_v10 }
  0xf2   : > { %2553 = vmatprep.subr.bf16.mxu0 %v3039_v6 }
 0x175   : > { %v648_v17 = vpop.xlane.xlu0 %647 }
 0x176   : > { %v650_v18 = vmul.f32 0.03125, %v648_v17 }
 0x178   : > { %v651_v19 = vadd.f32 1.1920929e-07, %v650_v18 }
 0x17a   : > { %2728 = vrsqrt.f32 %v651_v19 }
 0x184   : > { %v2729_v22 = vpop.eup %2728 }
 0x185   : > { %v653_v24 = vmul.f32 %v2729_v22, %v3412_v0 }
 0x187   : > { %v661_v26 = vmul.f32 %v2296_v23, %v653_v24 }
 0x189   : > { %2402 = vmatmul.mubr.msk.f32.vlgmr.msra.gmra.mrb[0].mxu0 %vm645_vm0, %v661_v26 }
 0x18a   : > { %2555 = vmatpush3.bf16.msra.mxu0 %v2554_v25  ;;  %2412 = vmatprep.mubr.msk.f32.mxu0 %vm3040_vm1, %v3041_v9 }
 0x18b   : > { %2556 = vmatprep.subr.bf16.mxu0 %v3039_v6 }
 0x18e   : > { %2558 = vmatpush3.bf16.msra.mxu0 %v2557_v29 }
 0x18f   : > { %2559 = vmatprep.subr.bf16.mxu0 %v3039_v6 }
 0x191   : > { %2413 = vmatmul.mubr.msk.f32.vlgmr.msra.gmra.mrb[2].mxu0 %vm645_vm0, %v661_v26 }
 0x192   : > { %2561 = vmatpush3.bf16.msra.mxu0 %v2560_v32  ;;  %2423 = vmatprep.mubr.msk.f32.mxu0 %vm3040_vm1, %v3041_v9 }
 0x193   : > { %2562 = vmatprep.subr.bf16.mxu0 %v3039_v6 }
 0x196   : > { %2564 = vmatpush3.bf16.msra.mxu0 %v2563_v35 }
 0x197   : > { %2571 = vmatprep.subr.bf16.mxu0 %v3039_v6 }
 0x199   : > { %2424 = vmatmul.mubr.msk.f32.vlgmr.msra.gmra.mrb[4].mxu0 %vm645_vm0, %v661_v26 }
 0x19a   : > { %2441 = vmatprep.mubr.msk.f32.mxu0 %vm3040_vm1, %v3041_v9  ;;  %2573 = vmatpush3.bf16.msra.mxu0 %v2572_v38 }
 0x19b   : > { %2449 = vmatprep.subr.mxu0 %v3041_v9 }
 0x25c   : > { %v735_v39 = vpop.f32.mrb[0].mxu0 }
 0x25d   : > { %v2403_v40 = vpop.f32.mrb[1].mxu0  ;;  %2435 = vmatmul.mubr.msk.f32.vlgmr.msra.gmra.mrb[0].mxu1 %vm645_vm0, %v735_v39  ;;  %v888_v48 = vmul.f32 %v887_v45, %v735_v39 }
 0x25e   : > { %2446 = vmatprep.mubr.msk.f32.mxu1 %vm3040_vm1, %v3041_v9 }
 0x264   : > { %v809_v41 = vpop.f32.mrb[2].mxu0 }
 0x265   : > { %v2414_v42 = vpop.f32.mrb[3].mxu0  ;;  %2442 = vmatmul.mubr.msk.f32.vlgmr.msra.gmra.mrb[6].mxu0 %vm973_vm2, %v809_v41  ;;  %v970_v56 = vmul.f32 %v969_v53, %v809_v41 }
 0x266   : > { %2451 = vmatprep.mubr.msk.f32.mxu0 %vm3040_vm1, %v3041_v9 }
 0x26c   : > { %v3487_v43 = vpop.f32.mrb[4].mxu0 }
 0x26d   : > { %v2425_v44 = vpop.f32.mrb[5].mxu0  ;;  %2450 = vmatpush3.msra.mxu0 %v3487_v43 }
 0x26e   : > { %2459 = vmatprep.subr.mxu0 %v3041_v9 }
 0x330   : > { %v962_v47 = vpop.f32.mrb[0].mxu1 }
 0x331   : > { %v967_v49 = vmul.f32 %v966_v46, %v962_v47  ;;  %v2436_v50 = vpop.f32.mrb[1].mxu1 }
 0x333   : > { %v968_v51 = vadd.f32 %v967_v49, %v888_v48 }
 0x335   : > { %v1050_v52 = vmul.f32 0.35355338, %v968_v51  ;;  %v1723_v51 = vld [vmem:[%s3782_s7] sm:$0xff] }
 0x337   : > { %1219 = vrot.lane.b32.xlu0 %v1050_v52, %s3042_s22 }
 0x338   : > { %v1043_v55 = vpop.f32.mrb[6].mxu0 }
 0x339   : > { %v1048_v57 = vmul.f32 %v1047_v54, %v1043_v55  ;;  %v2443_v58 = vpop.f32.mrb[7].mxu0 }
 0x33a   : > { %v1726_v58 = vld [vmem:[%s3782_s7 + $0x18] sm:$0xff] }
 0x33b   : > { %v1049_v59 = vadd.f32 %v1048_v57, %v970_v56  ;;  %v1725_v57 = vld [vmem:[%s3782_s7 + $0x10] sm:$0xff] }
 0x33d   : > { %1381 = vrot.lane.b32.xlu1 %v1049_v59, %s3042_s22  ;;  %2445 = vmatpush3.xpose.msk.msra.mxu1 %vm1056_vm3, %v1049_v59 }
 0x33e   : > { %2454 = vmatprep.subr.mxu1 %v3041_v9 }
 0x340   : > { %2447 = vmatmul.mubr.msk.f32.vlgmr.msra.gmra.mrb[2].mxu1 %vm1056_vm3, %v1050_v52 }
 0x341   : > { %1379 = vrot.lane.b32.xlu1 %v1050_v52, %s3043_s21  ;;  %2455 = vmatpush3.xpose.msk.msra.mxu1 %vm1056_vm3, %v1049_v59  ;;  %s3046_s21 = smov 16  }
 0x342   : > { %2456 = vmatprep.mubr.msk.f32.mxu1 %vm3040_vm1, %v3041_v9  ;;  %2464 = vmatprep.subr.mxu1 %v3041_v9 }
 0x345   : > { %1547 = vrot.lane.b32.xlu1 %v1050_v52, %s3044_s2  ;;  %v1724_v52 = vld [vmem:[%s3782_s7 + $0x8] sm:$0xff]  ;;  %s3047_s2 = smov 24  }
 0x346   : > { %v2575_v53 = vpack.c.bf16 %v1724_v52, %v1723_v51 }
 0x3a9   : > { %v1220_v60 = vpop.permute.xlu0 %1219 }
 0x3aa   : > { %2457 = vmatmul.mubr.msk.f32.vlgmr.msra.gmra.mrb[4].mxu1 %vm1056_vm3, %v1220_v60 }
 0x3ab   : > { %2466 = vmatprep.mubr.msk.f32.mxu1 %vm3040_vm1, %v3041_v9 }
 0x3af   : > { %v1382_v61 = vpop.permute.xlu1 %1381 }
 0x3b0   : > { %2465 = vmatpush3.xpose.msk.msra.mxu1 %vm1056_vm3, %v1382_v61 }
 0x3b1   : > { %2474 = vmatprep.subr.mxu1 %v3041_v9 }
 0x3b3   : > { %v1380_v62 = vpop.permute.xlu1 %1379 }
 0x3b4   : > { %2467 = vmatmul.mubr.msk.f32.vlgmr.msra.gmra.mrb[6].mxu1 %vm1056_vm3, %v1380_v62  ;;  %v2578_v62 = vpack.c.bf16 %v1726_v58, %v1725_v57 }
 0x3b5   : > { %2475 = vmatpush3.xpose.msk.msra.mxu1 %vm1056_vm3, %v1382_v61  ;;  %2476 = vmatprep.mubr.msk.f32.mxu1 %vm3040_vm1, %v3041_v9 }
 0x3b6   : > { %2574 = vmatprep.subr.bf16.mxu1 %v3039_v6 }
 0x3b7   : > { %v1548_v63 = vpop.permute.xlu1 %1547 }
 0x3b8   : > { %2477 = vmatmul.mubr.msk.f32.vlgmr.msra.gmra.mrb[8].mxu1 %vm1056_vm3, %v1548_v63 }
 0x3b9   : > { %2492 = vmatprep.mubr.msk.f32.mxu1 %vm3040_vm1, %v3041_v9  ;;  %2576 = vmatpush3.bf16.msra.mxu1 %v2575_v53 }
 0x3ba   : > { %2577 = vmatprep.subr.bf16.mxu1 %v3039_v6 }
 0x3bd   : > { %2579 = vmatpush3.bf16.msra.mxu1 %v2578_v62 }
 0x3be   : > { %2586 = vmatprep.subr.bf16.mxu1 %v3039_v6 }
 0x413   : > { %v1129_v5 = vpop.f32.mrb[2].mxu1 }
 0x414   : > { %v2448_v7 = vpop.f32.mrb[3].mxu1  ;;  %v1133_v8 = vsel %vm3513_vm4, %v1129_v5, -1e+30 }
 0x415   : > { %v1134_v10 = vsel %vm1056_vm3, %v1133_v8, -inf }
 0x416   : > { %1135 = vmax.xlane.f32.xlu1 %v1134_v10 }
 0x47d   : > { %v1289_v11 = vpop.f32.mrb[4].mxu1 }
 0x47e   : > { %v2458_v12 = vpop.f32.mrb[5].mxu1  ;;  %v1293_v13 = vsel %vm3513_vm4, %v1289_v11, -1e+30 }
 0x47f   : > { %v1294_v14 = vsel %vm1056_vm3, %v1293_v13, -inf }
 0x480   : > { %1295 = vmax.xlane.f32.xlu0 %v1294_v14 }
 0x487   : > { %v1453_v15 = vpop.f32.mrb[6].mxu1 }
 0x488   : > { %v2468_v16 = vpop.f32.mrb[7].mxu1  ;;  %v1457_v17 = vsel %vm3513_vm4, %v1453_v15, -1e+30 }
 0x489   : > { %v1458_v18 = vsel %vm1056_vm3, %v1457_v17, -inf }
 0x48a   : > { %1459 = vmax.xlane.f32.xlu1 %v1458_v18 }
 0x48b   : > { %v1617_v19 = vpop.f32.mrb[8].mxu1 }
 0x48c   : > { %v2478_v20 = vpop.f32.mrb[9].mxu1  ;;  %v1621_v21 = vsel %vm3513_vm4, %v1617_v19, -1e+30 }
 0x48d   : > { %v1622_v22 = vsel %vm1056_vm3, %v1621_v21, -inf }
 0x48e   : > { %1623 = vmax.xlane.f32.xlu1 %v1622_v22 }
 0x49f   : > { %1469 = vrot.lane.b32.xlu1 %v3487_v43, %s3042_s22  ;;  %s3045_s22 = smov 8  }
 0x4a3   : > { %v1136_v23 = vpop.xlane.xlu1 %1135 }
 0x4a4   : > { %v1137_v24 = vsub.f32 %v1129_v5, %v1136_v23 }
 0x4a6   : > { %v1138_v25 = vmul.f32 1.442695, %v1137_v24  ;;  %v1817_v24 = vld [vmem:[%s3783_s9] sm:$0xff] }
 0x4a8   : > { %2730 = vpow2.f32 %v1138_v25  ;;  %v1818_v25 = vld [vmem:[%s3783_s9 + $0x8] sm:$0xff] }
 0x4b2   : > { %v2731_v26 = vpop.eup %2730 }
 0x4b3   : > { %v1140_v27 = vsel %vm3513_vm4, %v2731_v26, 0.0  ;;  %v2581_v26 = vpack.c.bf16 %v1818_v25, %v1817_v24 }
 0x4b4   : > { %2452 = vmatmul.mubr.msk.f32.vlgmr.msra.gmra.mrb[8].mxu0 %vm1056_vm3, %v1140_v27  ;;  %v1141_v47 = vsel %vm1056_vm3, %v1140_v27, 0.0  ;;  %v1895_v27 = vld [vmem:[%s3784_s28 + $0x8] sm:$0xff] }
 0x4b5   : > { %2460 = vmatpush3.msra.mxu0 %v3487_v43  ;;  %2461 = vmatprep.mubr.msk.f32.mxu0 %vm3040_vm1, %v3041_v9 }
 0x4b6   : > { %2469 = vmatprep.subr.mxu0 %v3041_v9 }
 0x50d   : > { %v1296_v28 = vpop.xlane.xlu0 %1295 }
 0x50e   : > { %v1297_v29 = vsub.f32 %v1289_v11, %v1296_v28 }
 0x510   : > { %v1298_v30 = vmul.f32 1.442695, %v1297_v29  ;;  %v1819_v29 = vld [vmem:[%s3783_s9 + $0x10] sm:$0xff] }
 0x512   : > { %2732 = vpow2.f32 %v1298_v30  ;;  %v1820_v30 = vld [vmem:[%s3783_s9 + $0x18] sm:$0xff] }
 0x517   : > { %v1460_v31 = vpop.xlane.xlu1 %1459 }
 0x518   : > { %v1461_v32 = vsub.f32 %v1453_v15, %v1460_v31  ;;  %v2584_v31 = vpack.c.bf16 %v1820_v30, %v1819_v29 }
 0x51a   : > { %v1462_v33 = vmul.f32 1.442695, %v1461_v32  ;;  %v1896_v32 = vld [vmem:[%s3784_s28 + $0x10] sm:$0xff] }
 0x51b   : > { %v1624_v34 = vpop.xlane.xlu1 %1623 }
 0x51c   : > { %v2733_v35 = vpop.eup %2732  ;;  %2734 = vpow2.f32 %v1462_v33  ;;  %v1625_v36 = vsub.f32 %v1617_v19, %v1624_v34  ;;  %v1897_v33 = vld [vmem:[%s3784_s28 + $0x18] sm:$0xff] }
 0x51d   : > { %v1300_v37 = vsel %vm3513_vm4, %v2733_v35, 0.0  ;;  %v2590_v34 = vpack.c.bf16 %v1897_v33, %v1896_v32 }
 0x51e   : > { %v1626_v38 = vmul.f32 1.442695, %v1625_v36  ;;  %2462 = vmatmul.mubr.msk.f32.vlgmr.msra.gmra.mrb[10].mxu0 %vm1056_vm3, %v1300_v37  ;;  %v1301_v39 = vsel %vm1056_vm3, %v1300_v37, 0.0 }
 0x51f   : > { %v1470_v40 = vpop.permute.xlu1 %1469  ;;  %1302 = vadd.xlane.f32.xlu0 %v1301_v39  ;;  %2471 = vmatprep.mubr.msk.f32.mxu0 %vm3040_vm1, %v3041_v9  ;;  %v1969_v39 = vld [vmem:[%s3785_s8 + $0x8] sm:$0xff] }
 0x520   : > { %2736 = vpow2.f32 %v1626_v38  ;;  %2470 = vmatpush3.msra.mxu0 %v1470_v40  ;;  %v1968_v38 = vld [vmem:[%s3785_s8] sm:$0xff] }
 0x521   : > { %2479 = vmatprep.subr.mxu0 %v3041_v9 }
 0x526   : > { %v2735_v41 = vpop.eup %2734 }
 0x527   : > { %v1464_v42 = vsel %vm3513_vm4, %v2735_v41, 0.0  ;;  %v2315_v41 = vld [vmem:[%s3786_s29] ss:$0 sm:$0xff] }
 0x528   : > { %2472 = vmatmul.mubr.msk.f32.vlgmr.msra.gmra.mrb[12].mxu0 %vm1056_vm3, %v1464_v42  ;;  %v1465_v43 = vsel %vm1056_vm3, %v1464_v42, 0.0 }
 0x529   : > { %2480 = vmatpush3.msra.mxu0 %v1470_v40  ;;  %1466 = vadd.xlane.f32.xlu0 %v1465_v43  ;;  %v2593_v43 = vpack.c.bf16 %v1969_v39, %v1968_v38 }
 0x52a   : > { %v2737_v44 = vpop.eup %2736  ;;  %2481 = vmatprep.mubr.msk.f32.mxu0 %vm3040_vm1, %v3041_v9  ;;  %2580 = vmatprep.subr.bf16.mxu0 %v3039_v6 }
 0x52b   : > { %v1628_v45 = vsel %vm3513_vm4, %v2737_v44, 0.0 }
 0x52c   : > { %2482 = vmatmul.mubr.msk.f32.vlgmr.msra.gmra.mrb[14].mxu0 %vm1056_vm3, %v1628_v45  ;;  %v1629_v46 = vsel %vm1056_vm3, %v1628_v45, 0.0  ;;  %v1970_v45 = vld [vmem:[%s3785_s8 + $0x10] sm:$0xff] }
 0x52d   : > { %1630 = vadd.xlane.f32.xlu0 %v1629_v46  ;;  %2503 = vmatprep.mubr.msk.f32.mxu0 %vm3040_vm1, %v3041_v9  ;;  %v1971_v46 = vld [vmem:[%s3785_s8 + $0x18] sm:$0xff] }
 0x52e   : > { %2582 = vmatpush3.bf16.msra.mxu0 %v2581_v26 }
 0x52f   : > { %2583 = vmatprep.subr.bf16.mxu0 %v3039_v6 }
 0x531   : > { %1142 = vadd.xlane.f32.xlu0 %v1141_v47  ;;  %v2596_v47 = vpack.c.bf16 %v1971_v46, %v1970_v45 }
 0x532   : > { %2585 = vmatpush3.bf16.msra.mxu0 %v2584_v31 }
 0x533   : > { %2592 = vmatprep.subr.bf16.mxu0 %v3039_v6 }
 0x587   : > { %v1213_v48 = vpop.f32.mrb[8].mxu0 }
 0x588   : > { %v2453_v49 = vpop.f32.mrb[9].mxu0 }
 0x5ac   : > { %v1303_v50 = vpop.xlane.xlu0 %1302 }
 0x5ad   : > { %2738 = vrcp.f32 %v1303_v50 }
 0x5b6   : > { %v1467_v54 = vpop.xlane.xlu0 %1466 }
 0x5b7   : > { %v2739_v55 = vpop.eup %2738  ;;  %2740 = vrcp.f32 %v1467_v54 }
 0x5ba   : > { %v1631_v59 = vpop.xlane.xlu0 %1630 }
 0x5bb   : > { %2742 = vrcp.f32 %v1631_v59 }
 0x5be   : > { %v1143_v10 = vpop.xlane.xlu0 %1142 }
 0x5bf   : > { %2744 = vrcp.f32 %v1143_v10 }
 0x5c1   : > { %v2741_v63 = vpop.eup %2740 }
 0x5c5   : > { %v2743_v4 = vpop.eup %2742 }
 0x5c9   : > { %v2745_v11 = vpop.eup %2744 }
 0x5ca   : > { %v1218_v14 = vmul.f32 %v2745_v11, %v1213_v48 }
 0x5f1   : > { %v1373_v56 = vpop.f32.mrb[10].mxu0 }
 0x5f2   : > { %v1378_v60 = vmul.f32 %v2739_v55, %v1373_v56  ;;  %v2463_v61 = vpop.f32.mrb[11].mxu0 }
 0x5f4   : > { %1708 = vrot.lane.b32.xlu0 %v1378_v60, %s3045_s22  ;;  %s2322_s22 = sshll.u32 %s3160_s0, 7  ;;  %s2136_s0 = scalar_lea.sflag [#allocation4], %s3390_s19 }
 0x5f5   : > { %s3670_s30 = scalar_lea.hbm %s3789_s17, %s2322_s22 }
 0x5fb   : > { %v1541_v1 = vpop.f32.mrb[12].mxu0 }
 0x5fc   : > { %v1546_v2 = vmul.f32 %v2741_v63, %v1541_v1  ;;  %v2473_v3 = vpop.f32.mrb[13].mxu0 }
 0x5fe   : > { %1712 = vrot.lane.b32.xlu1 %v1546_v2, %s3046_s21  ;;  %s3788_s21 = sshll.u32 %s3390_s19, 3 }
 0x5ff   : > { %v1701_v5 = vpop.f32.mrb[14].mxu0  ;;  %s642_s10 = scalar_lea.vmem [#allocation14], %s3788_s21  ;;  %s3048_s21 = smov [#allocation14]  }
 0x600   : > { %v1706_v7 = vmul.f32 %v2743_v4, %v1701_v5  ;;  %v2483_v8 = vpop.f32.mrb[15].mxu0  ;;  %s2149_s3 = sshll.u32 %s642_s10, 4  ;;  %s3672_s3 = int_to_ptr.vmem [resolvable:$true] %s2149_s3 }
 0x601   : > { %s2950_s29 = scalar_lea.vmem %s3672_s3, 128 }
 0x602   : > { %1716 = vrot.lane.b32.xlu1 %v1706_v7, %s3047_s2  ;;  %s3787_s2 = sld [smem:[#allocation29_spill]]  ;;  %p2951_p6 = scmp.ne.s32.totalorder %s3672_s3, %s2950_s29 }
 0x604   : > { %p2952_p5 = pnand %p2951_p6, %p3790_p12 }
 0x606   : > { %p2953_p7 = pneg %p2952_p5 }
 0x608   : > { %v2051_v48 = vld [vmem:[%s3787_s2] sm:$0xff]  ;;  %v2052_v49 = vld [vmem:[%s3787_s2 + $0x8] sm:$0xff]  ;;  %v2053_v51 = vld [vmem:[%s3787_s2 + $0x10] sm:$0xff] }
 0x609   : > { %v2599_v50 = vpack.c.bf16 %v2052_v49, %v2051_v48  ;;  %v2055_v53 = vld [vmem:[%s3787_s2 + $0x20] sm:$0xff]  ;;  %v2056_v54 = vld [vmem:[%s3787_s2 + $0x28] sm:$0xff]  ;;  %v2057_v56 = vld [vmem:[%s3787_s2 + $0x30] sm:$0xff] }
 0x60a   : > { %v2605_v55 = vpack.c.bf16 %v2056_v54, %v2055_v53  ;;  %v2058_v57 = vld [vmem:[%s3787_s2 + $0x38] sm:$0xff] }
 0x60b   : > { %v2608_v58 = vpack.c.bf16 %v2058_v57, %v2057_v56 }
 0x666   : > { %v1709_v12 = vpop.permute.xlu0 %1708 }
 0x667   : > { %v1719_v15 = vsel %vm1056_vm3, %v1218_v14, %v1709_v12 }
 0x670   : > { %v1713_v13 = vpop.permute.xlu1 %1712 }
 0x671   : > { %v1720_v16 = vsel %vm973_vm2, %v1719_v15, %v1713_v13 }
 0x674   : > { %v1717_v17 = vpop.permute.xlu1 %1716 }
 0x675   : > { %v1722_v18 = vsel %vm1721_vm5, %v1720_v16, %v1717_v17 }
 0x676   : > { %2493 = vmatmul.mubr.msk.f32.vlgmr.msra.gmra.mrb[10].mxu1 %vm645_vm0, %v1722_v18 }
 0x677   : > { %2514 = vmatprep.mubr.msk.f32.mxu1 %vm3040_vm1, %v3041_v9 }
 0x749   : > { %v1796_v19 = vpop.f32.mrb[10].mxu1 }
 0x74a   : > { %v3579_v20 = vadd.f32 %v1796_v19, %v3412_v0  ;;  %v2494_v21 = vpop.f32.mrb[11].mxu1  ;;  %v1894_v0 = vld [vmem:[%s3784_s28] sm:$0xff] }
 0x74b   : > { %v2587_v28 = vpack.c.bf16 %v1895_v27, %v1894_v0 }
 0x74c   : > { %v1801_v22 = vmul.f32 %v3579_v20, %v3579_v20 }
 0x74d   : > { %2588 = vmatpush3.bf16.msra.mxu1 %v2587_v28 }
 0x74e   : > { %v1802_v23 = vsel %vm645_vm0, %v1801_v22, 0.0  ;;  %2589 = vmatprep.subr.bf16.mxu1 %v3039_v6 }
 0x74f   : > { %1803 = vadd.xlane.f32.xlu1 %v1802_v23 }
 0x751   : > { %2591 = vmatpush3.bf16.msra.mxu1 %v2590_v34 }
 0x752   : > { %2598 = vmatprep.subr.bf16.mxu1 %v3039_v6 }
 0x7dc   : > { %v1804_v35 = vpop.xlane.xlu1 %1803 }
 0x7dd   : > { %v1805_v36 = vmul.f32 0.03125, %v1804_v35 }
 0x7df   : > { %v1806_v37 = vadd.f32 1.1920929e-07, %v1805_v36 }
 0x7e1   : > { %2746 = vrsqrt.f32 %v1806_v37 }
 0x7eb   : > { %v2747_v40 = vpop.eup %2746 }
 0x7ec   : > { %v1808_v42 = vmul.f32 %v2747_v40, %v3579_v20 }
 0x7ee   : > { %v1816_v44 = vmul.f32 %v2315_v41, %v1808_v42 }
 0x7f0   : > { %2504 = vmatmul.mubr.msk.f32.vlgmr.msra.gmra.mrb[16].mxu0 %vm645_vm0, %v1816_v44  ;;  %2515 = vmatmul.mubr.msk.f32.vlgmr.msra.gmra.mrb[12].mxu1 %vm645_vm0, %v1816_v44 }
 0x7f1   : > { %2594 = vmatpush3.bf16.msra.mxu0 %v2593_v43  ;;  %2525 = vmatprep.mubr.msk.f32.mxu0 %vm3040_vm1, %v3041_v9 }
 0x7f2   : > { %2595 = vmatprep.subr.bf16.mxu0 %v3039_v6  ;;  %2544 = vmatprep.mubr.msk.f32.mxu1 %vm3040_vm1, %v3041_v9  ;;  %v2054_v9 = vld [vmem:[%s3787_s2 + $0x18] sm:$0xff]  ;;  %s2954_s2 = sshll.u32 %s3048_s21, 4  ;;  %s2955_s2 = int_to_ptr.vmem [resolvable:$false] %s2954_s2 }
 0x7f3   : > { %2600 = vmatpush3.bf16.msra.mxu1 %v2599_v50  ;;  %v2602_v52 = vpack.c.bf16 %v2054_v9, %v2053_v51  ;;  %s2956_s4 = scalar_lea.vmem %s2955_s2, 256  ;;  %p2957_p4 = scmp.lt.s32.totalorder %s3672_s3, %s2955_s2 }
 0x7f4   : > { %2601 = vmatprep.subr.bf16.mxu1 %v3039_v6  ;;  %p2958_p1 = scmp.lt.s32.totalorder %s2956_s4, %s2950_s29 }
 0x7f5   : > { %2597 = vmatpush3.bf16.msra.mxu0 %v2596_v47 }
 0x7f6   : > { %p2959_p3 = por %p2958_p1, %p2957_p4 }
 0x7f7   : > { %2603 = vmatpush3.bf16.msra.mxu1 %v2602_v52 }
 0x7f8   : > { %2526 = vmatmul.mubr.msk.f32.vlgmr.msra.gmra.mrb[18].mxu0 %vm645_vm0, %v1816_v44  ;;  %2604 = vmatprep.subr.bf16.mxu1 %v3039_v6  ;;  %p2960_p9 = pnand %p2959_p3, %p2953_p7 }
 0x7fb   : > { %2606 = vmatpush3.bf16.msra.mxu1 %v2605_v55 }
 0x7fc   : > { %2607 = vmatprep.subr.bf16.mxu1 %v3039_v6 }
 0x7ff   : > { %2609 = vmatpush3.bf16.msra.mxu1 %v2608_v58 }
 0x8c3   : > { %v1890_v59 = vpop.f32.mrb[16].mxu0  ;;  %v1964_v60 = vpop.f32.mrb[12].mxu1 }
 0x8c4   : > { %v2319_v61 = vmul.f32 -1.442695, %v1964_v60  ;;  %v2505_v62 = vpop.f32.mrb[17].mxu0  ;;  %v2516_v63 = vpop.f32.mrb[13].mxu1 }
 0x8c6   : > { %2748 = vpow2.f32 %v2319_v61 }
 0x8cb   : > { %v2038_v1 = vpop.f32.mrb[18].mxu0 }
 0x8cc   : > { %v2527_v6 = vpop.f32.mrb[19].mxu0 }
 0x8d0   : > { %v2749_v2 = vpop.eup %2748 }
 0x8d1   : > { %v2045_v3 = vadd.f32 1.0, %v2749_v2 }
 0x8d3   : > { %2750 = vrcp.f32 %v2045_v3 }
 0x8dd   : > { %v2751_v4 = vpop.eup %2750 }
 0x8de   : > { %v2048_v5 = vmul.f32 %v2751_v4, %v1964_v60 }
 0x8e0   : > { %v2049_v7 = vmul.f32 %v2048_v5, %v1890_v59 }
 0x8e2   : > { %v2050_v8 = vmul.f32 %v2049_v7, %v2038_v1 }
 0x8e4   : > { %2545 = vmatmul.mubr.msk.f32.vlgmr.msra.gmra.mrb[14].mxu1 %vm2059_vm6, %v2050_v8 }
 0x9b7   : > { %v2129_v10 = vpop.f32.mrb[14].mxu1 }
 0x9b8   : > { %v2133_v11 = vadd.f32 %v2129_v10, %v3579_v20  ;;  %v2546_v12 = vpop.f32.mrb[15].mxu1 }
 0x9ba   : > { %2134 = vst.msk [vmem:[%s642_s10] sm:$0xff] %vm645_vm0, %v2133_v11 }
 0x9bb   : > { %2963 = shalt.err (!%p2960_p9)
}
 0x9bc   : > { %s2964_s19 = scalar_lea.hbm %s3670_s30, 128  ;;  %s2968_s1 = scalar_lea.hbm %s3789_s17, 256 }
 0x9bd   : > { %p2965_p13 = scmp.ne.s32.totalorder %s3670_s30, %s2964_s19  ;;  %p2969_p8 = scmp.lt.u32.totalorder %s3670_s30, %s3789_s17 }
 0x9be   : > { %p2970_p10 = scmp.lt.u32.totalorder %s2968_s1, %s2964_s19  ;;  %p2972_p6 = scmp.lt.u32.totalorder %s2964_s19, %s3670_s30 }
 0x9bf   : > { %p2966_p0 = pnand %p2965_p13, %p3790_p12 }
 0x9c0   : > { %p2971_p11 = por %p2970_p10, %p2969_p8 }
 0x9c1   : > { %p2967_p2 = pneg %p2966_p0 }
 0x9c2   : > { %p2973_p5 = por %p2972_p6, %p2971_p11 }
 0x9c4   : > { %p2974_p7 = pnand %p2973_p5, %p2967_p2 }
 0x9c6   : > { %2977 = shalt.err (!%p2974_p7)
}
 0x9c7   : > { %2636 = dma.vmem_to_hbm [thread:$0]  (%p3790_p12), %s3672_s3, 128, %s3670_s30, %s2136_s0  }
 0x9c8 PF: > { %s2161_s4 = sand.u32 1, %s3016_s24   ;;  %p3791_p4 = scmp.ne.s32.totalorder %s3767_s6, 0 }
 0x9c9   : > { %p3792_p1 = scmp.ge.s32.totalorder %s3028_s27, 2  ;;  %s2162_s29 = scalar_lea.sflag [#allocation4], %s2161_s4 }
 0x9cb   : > { %p2662_p3 = pnand %p3792_p1, %p3791_p4 }
 0x9cd   : > { %3011 = dma.done.wait (!%p2662_p3), %s2162_s29, 128  }
 0x9ce   : > { %3013 = vsyncadd (!%p2662_p3), %s2162_s29, 4294967168  ;;  %p33_p9 = scmp.ge.s32.totalorder %s3314_s18, 4   ;;  %s3793_s24 = smov %s3020_s25 }
 0x9cf   : > { %s3794_s25 = smov %s3024_s26  ;;  %s3795_s26 = smov %s3325_s20 }
 0x9d0   : > { %s3796_s27 = smov %s3314_s18  ;;  %35 = sbr.rel (!%p33_p9) target bundleno = 22 (0x16), region = 157 }
 0x9d7   :  { %2167 = vsyncpa [#allocation3], 1 }
 0x9d8   :  { %2169 = vsyncpa [#allocation3 + $0x1], 1 }
 0x9d9   :  { %2170 = vsyncpa [#allocation6], 1 }
 0x9da   :  { %2171 = vsyncpa [#allocation9], 1 }
 0x9db   :  { %2172 = vsyncpa [#allocation12], 1 }
 0x9dc   :  { %2173 = vsyncpa [#allocation4], 1 }
 0x9dd   :  { %2175 = vsyncpa [#allocation4 + $0x1], 1 }

</bundles_post_ra>
